<compile_context>
chip_gen: v6e
topology: v6e:2x2x1
jax: 0.10.0
libtpu: 0.0.40
codegen_flags: <defaults>
</compile_context>

<pallas_src>
import functools
import math

import jax
import jax.numpy as jnp
from jax.experimental import pallas as pl
from jax.experimental.pallas import tpu as pltpu


# ----------------------------------------------------------------------------
# Kernel
# ----------------------------------------------------------------------------
def encoder_layer_kernel(
    x_ref, mask_ref,
    wq_ref, bq_ref, wk_ref, bk_ref, wv_ref, bv_ref, wo_ref, bo_ref,
    ln1_g_ref, ln1_b_ref,
    w1_ref, b1_ref, w2_ref, b2_ref,
    ln2_g_ref, ln2_b_ref,
    out_ref, attn_ref,
    k_scr, v_scr, ctx_scr,
    *, n_heads, inv_scale, eps, tq,
):
    S, D = x_ref.shape
    hd = D // n_heads
    qi = pl.program_id(1)
    mask_heads = mask_ref.shape[0]          # 1 (broadcast mask) or n_heads

    # ---- K / V projection: once per batch element (persistent bf16 scratch) ----
    @pl.when(qi == 0)
    def _():
        x_bf = x_ref[...].astype(jnp.bfloat16)                      # (S, D)
        k_scr[...] = (jnp.dot(x_bf, wk_ref[...],
                              preferred_element_type=jnp.float32)
                      + bk_ref[...]).astype(jnp.bfloat16)
        v_scr[...] = (jnp.dot(x_bf, wv_ref[...],
                              preferred_element_type=jnp.float32)
                      + bv_ref[...]).astype(jnp.bfloat16)

    # ---- Q projection for this query tile (bf16 MXU, f32 accumulate) ----
    if tq == S:
        xq_f32 = x_ref[...]                                         # (tq, D) residual
    else:
        q_start = pl.multiple_of(qi * tq, tq)
        xq_f32 = x_ref[pl.ds(q_start, tq), :]
    q = jnp.dot(xq_f32.astype(jnp.bfloat16), wq_ref[...],
                preferred_element_type=jnp.float32) + bq_ref[...]
    # fold 1/scale into Q once (cheaper than dividing every (tq, S) score tile)
    q = (q * inv_scale).astype(jnp.bfloat16)                        # (tq, D)

    k = k_scr[...]                                                  # (S, D) bf16
    v = v_scr[...]                                                  # (S, D) bf16

    contract_last = (((1,), (1,)), ((), ()))
    for h in range(n_heads):
        sl = slice(h * hd, (h + 1) * hd)
        # Q @ K^T without an explicit transpose (contract last dims)
        score = jax.lax.dot_general(q[:, sl], k[:, sl], contract_last,
                                    preferred_element_type=jnp.float32)  # (tq, S)
        m = mask_ref[h % mask_heads]                                # (tq, S) int8
        # matches torch reference: attention_score[mask] = 1e-10
        score = jnp.where(m != 0, jnp.float32(1e-10), score)

        smax = jnp.max(score, axis=-1, keepdims=True)
        e = jnp.exp(score - smax)
        w = e * pl.reciprocal(jnp.sum(e, axis=-1, keepdims=True), approx=True)
        attn_ref[h] = w.astype(attn_ref.dtype)

        # per-head context written at a static lane offset; no concat/relayout
        ctx_scr[:, sl] = jnp.dot(w.astype(jnp.bfloat16), v[:, sl],
                                 preferred_element_type=jnp.float32
                                 ).astype(jnp.bfloat16)

    # ---- single full-K output projection (restores MXU utilization) ----
    mha = jnp.dot(ctx_scr[...], wo_ref[...],
                  preferred_element_type=jnp.float32) + bo_ref[...]

    # ---- residual + LayerNorm 1 (f32) ----
    y = xq_f32 + mha
    mu = jnp.mean(y, axis=-1, keepdims=True)
    var = jnp.mean((y - mu) ** 2, axis=-1, keepdims=True)
    y = (y - mu) * jax.lax.rsqrt(var + eps) * ln1_g_ref[...] + ln1_b_ref[...]

    # ---- FeedForward (bf16 MXU, f32 accumulate); dropout = identity ----
    h1 = jnp.dot(y.astype(jnp.bfloat16), w1_ref[...],
                 preferred_element_type=jnp.float32) + b1_ref[...]
    h1 = jnp.maximum(h1, 0.0)
    ff = jnp.dot(h1.astype(jnp.bfloat16), w2_ref[...],
                 preferred_element_type=jnp.float32) + b2_ref[...]

    # ---- residual + LayerNorm 2 (f32) ----
    z = y + ff
    mu2 = jnp.mean(z, axis=-1, keepdims=True)
    var2 = jnp.mean((z - mu2) ** 2, axis=-1, keepdims=True)
    z = (z - mu2) * jax.lax.rsqrt(var2 + eps) * ln2_g_ref[...] + ln2_b_ref[...]

    out_ref[...] = z.astype(out_ref.dtype)


# ----------------------------------------------------------------------------
# VMEM budgeting / query-tile selection (generation-aware)
# ----------------------------------------------------------------------------
def _vmem_budget_bytes():
    phys = 64 << 20                      # conservative default = v7x per-TC VMEM
    try:
        cap = getattr(pltpu.get_tpu_info(), "vmem_capacity_bytes", None)
        if cap:
            phys = int(cap)
    except Exception:
        pass
    # ~80% of physical: 64 MiB -> ~51 MiB (v7x headroom for compiler scratch),
    # 128 MiB -> ~102 MiB (v5e / v6e can use bigger tiles).
    return int(phys * 0.8)


def _vmem_estimate_bytes(S, tq, H, D, d_ff, attn_bytes):
    # Pipelined (double-buffered) blocks.
    blocks = (S * D * 4                   # x block (f32, full sequence per batch)
              + H * tq * S * 1            # mask block (int8)
              + H * tq * S * attn_bytes   # attention-weights output block
              + tq * D * 4)               # encoder output block (f32)
    weights = (4 * D * D + 2 * D * d_ff) * 2        # bf16 weights
    biases = (9 * D + d_ff) * 4                     # f32 biases / LN params
    scratch = (2 * S * D + tq * D) * 2              # K/V/ctx bf16 scratch
    temps = (2 * S * D * 4                # K/V projection f32 results
             + 6 * tq * S * 4             # score / exp / softmax live copies
             + 2 * tq * d_ff * 4          # FF hidden
             + 8 * tq * D * 4)            # q / mha / y / z
    return 2 * (blocks + weights + biases) + scratch + temps


def _pick_query_tile(S, H, D, d_ff, attn_bytes, budget):
    cands = [t for t in (1024, 512, 256, 128) if t < S and S % t == 0]
    if S <= 1024:
        cands = [S] + cands
    if not cands:
        # TODO(synk): pad + mask a tail query tile for long sequences that are
        # not a multiple of 128 instead of falling back to a whole-seq tile.
        cands = [S]
    for t in cands:                        # largest tile that fits the budget
        if _vmem_estimate_bytes(S, t, H, D, d_ff, attn_bytes) <= budget:
            return t
    return cands[-1]


# ----------------------------------------------------------------------------
# Wrapper
# ----------------------------------------------------------------------------
def encoder_layer(x, enc_mask, params, *, n_heads, eps=1e-5,
                  attn_dtype=jnp.bfloat16):
    B, S, D = x.shape
    assert D % n_heads == 0
    d_ff = params["w1"].shape[1]
    H = n_heads
    MH = enc_mask.shape[1]                 # 1 (broadcast padding mask) or H
    inv_scale = 1.0 / math.sqrt(D / n_heads)

    attn_bytes = jnp.dtype(attn_dtype).itemsize
    budget = _vmem_budget_bytes()
    TQ = _pick_query_tile(S, H, D, d_ff, attn_bytes, budget)
    n_q = S // TQ

    # ---- operand prep: bf16 weights, f32 (1, .) biases, int8 mask, f32 x ----
    bf = lambda w: params[w].astype(jnp.bfloat16)
    fb = lambda b: params[b].reshape(1, -1).astype(jnp.float32)
    wq, wk, wv, wo, w1, w2 = bf("wq"), bf("wk"), bf("wv"), bf("wo"), bf("w1"), bf("w2")
    bq, bk, bv, bo = fb("bq"), fb("bk"), fb("bv"), fb("bo")
    ln1_g, ln1_b, b1, b2 = fb("ln1_g"), fb("ln1_b"), fb("b1"), fb("b2")
    ln2_g, ln2_b = fb("ln2_g"), fb("ln2_b")
    mask_i8 = (enc_mask != 0).astype(jnp.int8)
    x = x.astype(jnp.float32)

    full2d = lambda shp: pl.BlockSpec(shp, lambda b, qi: (0, 0))

    grid_spec = pltpu.PrefetchScalarGridSpec(
        num_scalar_prefetch=0,
        grid=(B, n_q),
        in_specs=[
            pl.BlockSpec((None, S, D), lambda b, qi: (b, 0, 0)),            # x
            pl.BlockSpec((None, MH, TQ, S), lambda b, qi: (b, 0, qi, 0)),   # mask
            full2d((D, D)), full2d((1, D)),        # Wq, bq
            full2d((D, D)), full2d((1, D)),        # Wk, bk
            full2d((D, D)), full2d((1, D)),        # Wv, bv
            full2d((D, D)), full2d((1, D)),        # Wo, bo
            full2d((1, D)), full2d((1, D)),        # LN1 gamma, beta
            full2d((D, d_ff)), full2d((1, d_ff)),  # W1, b1
            full2d((d_ff, D)), full2d((1, D)),     # W2, b2
            full2d((1, D)), full2d((1, D)),        # LN2 gamma, beta
        ],
        out_specs=[
            pl.BlockSpec((None, TQ, D), lambda b, qi: (b, qi, 0)),          # out
            pl.BlockSpec((None, H, TQ, S), lambda b, qi: (b, 0, qi, 0)),    # attn
        ],
        scratch_shapes=[
            pltpu.VMEM((S, D), jnp.bfloat16),      # K (persistent across qi)
            pltpu.VMEM((S, D), jnp.bfloat16),      # V (persistent across qi)
            pltpu.VMEM((TQ, D), jnp.bfloat16),     # per-tile context buffer
        ],
    )

    kernel = functools.partial(
        encoder_layer_kernel,
        n_heads=n_heads, inv_scale=inv_scale, eps=eps, tq=TQ,
    )

    # NOTE: batch axis "parallel" (feeds v7x's 2 TensorCores); query-tile axis
    # must be "arbitrary" because K/V scratch is carried across query tiles.
    # If B == 1 and n_q > 1, precomputing K/V outside the kernel would let both
    # axes be parallel — not needed for the shapes exercised here.
    out, attn = pl.pallas_call(
        kernel,
        grid_spec=grid_spec,
        out_shape=(
            jax.ShapeDtypeStruct((B, S, D), jnp.float32),
            jax.ShapeDtypeStruct((B, H, S, S), attn_dtype),
        ),
        compiler_params=pltpu.CompilerParams(
            dimension_semantics=("parallel", "arbitrary"),
            vmem_limit_bytes=budget,
        ),
    )(
        x, mask_i8,
        wq, bq, wk, bk, wv, bv, wo, bo,
        ln1_g, ln1_b,
        w1, b1, w2, b2,
        ln2_g, ln2_b,
    )
    return out, attn


# ----------------------------------------------------------------------------
# Params / pure-JAX reference
# ----------------------------------------------------------------------------
def init_params(key, d_model, d_ff):
    ks = jax.random.split(key, 6)
    s = 0.02
    return {
        "wq": s * jax.random.normal(ks[0], (d_model, d_model), jnp.float32),
        "bq": jnp.zeros((1, d_model), jnp.float32),
        "wk": s * jax.random.normal(ks[1], (d_model, d_model), jnp.float32),
        "bk": jnp.zeros((1, d_model), jnp.float32),
        "wv": s * jax.random.normal(ks[2], (d_model, d_model), jnp.float32),
        "bv": jnp.zeros((1, d_model), jnp.float32),
        "wo": s * jax.random.normal(ks[3], (d_model, d_model), jnp.float32),
        "bo": jnp.zeros((1, d_model), jnp.float32),
        "ln1_g": jnp.ones((1, d_model), jnp.float32),
        "ln1_b": jnp.zeros((1, d_model), jnp.float32),
        "w1": s * jax.random.normal(ks[4], (d_model, d_ff), jnp.float32),
        "b1": jnp.zeros((1, d_ff), jnp.float32),
        "w2": s * jax.random.normal(ks[5], (d_ff, d_model), jnp.float32),
        "b2": jnp.zeros((1, d_model), jnp.float32),
        "ln2_g": jnp.ones((1, d_model), jnp.float32),
        "ln2_b": jnp.zeros((1, d_model), jnp.float32),
    }


def encoder_layer_ref(x, enc_mask, params, n_heads, eps=1e-5):
    """Pure-JAX f32 reference mirroring the PyTorch module (eval mode)."""
    B, S, D = x.shape
    hd = D // n_heads
    scale = math.sqrt(D / n_heads)
    lin = lambda a, w, b: a @ w + b[0]
    q = lin(x, params["wq"], params["bq"]).reshape(B, S, n_heads, hd).transpose(0, 2, 1, 3)
    k = lin(x, params["wk"], params["bk"]).reshape(B, S, n_heads, hd).transpose(0, 2, 1, 3)
    v = lin(x, params["wv"], params["bv"]).reshape(B, S, n_heads, hd).transpose(0, 2, 1, 3)
    score = jnp.einsum("bhqd,bhkd->bhqk", q, k) / scale
    score = jnp.where(enc_mask != 0, jnp.float32(1e-10), score)
    w = jax.nn.softmax(score, axis=-1)
    ctx = jnp.einsum("bhqk,bhkd->bhqd", w, v).transpose(0, 2, 1, 3).reshape(B, S, D)
    mha = lin(ctx, params["wo"], params["bo"])

    def ln(a, g, b):
        mu = a.mean(-1, keepdims=True)
        var = ((a - mu) ** 2).mean(-1, keepdims=True)
        return (a - mu) * jax.lax.rsqrt(var + eps) * g[0] + b[0]

    y = ln(x + mha, params["ln1_g"], params["ln1_b"])
    h1 = jnp.maximum(lin(y, params["w1"], params["b1"]), 0.0)
    z = ln(y + lin(h1, params["w2"], params["b2"]), params["ln2_g"], params["ln2_b"])
    return z, w


if __name__ == "__main__":
    # small shapes consistent with the module
    B, S, d_model, d_ff, n_heads = 2, 8, 32, 64, 4

    key = jax.random.PRNGKey(0)
    kx, km, kp = jax.random.split(key, 3)

    x = jax.random.normal(kx, (B, S, d_model), jnp.float32)
    # boolean padding-style mask, nonzero => masked (score forced to 1e-10)
    enc_mask = (jax.random.uniform(km, (B, n_heads, S, S)) < 0.1).astype(jnp.int32)

    params = init_params(kp, d_model, d_ff)

    out, attn = encoder_layer(x, enc_mask, params, n_heads=n_heads)
    jax.block_until_ready((out, attn))

    assert out.shape == (B, S, d_model)
    assert attn.shape == (B, n_heads, S, S)

    # sanity check vs f32 reference (loose tolerance: matmuls in bf16, attn bf16)
    out_ref, attn_ref_w = encoder_layer_ref(x, enc_mask, params, n_heads)
    assert float(jnp.max(jnp.abs(out - out_ref))) < 5e-2
    assert float(jnp.max(jnp.abs(attn.astype(jnp.float32) - attn_ref_w))) < 2e-2

    print("KERNEL_OK")
</pallas_src>

<mosaic_0001>
module attributes {stable_mosaic.version = 11 : i64} {
  func.func @encoder_layer_kernel(%arg0: i32, %arg1: i32, %arg2: memref<1x8x32xf32, #tpu.memory_space<vmem>>, %arg3: memref<1x4x8x8xi8, #tpu.memory_space<vmem>>, %arg4: memref<32x32xbf16, #tpu.memory_space<vmem>>, %arg5: memref<1x32xf32, #tpu.memory_space<vmem>>, %arg6: memref<32x32xbf16, #tpu.memory_space<vmem>>, %arg7: memref<1x32xf32, #tpu.memory_space<vmem>>, %arg8: memref<32x32xbf16, #tpu.memory_space<vmem>>, %arg9: memref<1x32xf32, #tpu.memory_space<vmem>>, %arg10: memref<32x32xbf16, #tpu.memory_space<vmem>>, %arg11: memref<1x32xf32, #tpu.memory_space<vmem>>, %arg12: memref<1x32xf32, #tpu.memory_space<vmem>>, %arg13: memref<1x32xf32, #tpu.memory_space<vmem>>, %arg14: memref<32x64xbf16, #tpu.memory_space<vmem>>, %arg15: memref<1x64xf32, #tpu.memory_space<vmem>>, %arg16: memref<64x32xbf16, #tpu.memory_space<vmem>>, %arg17: memref<1x32xf32, #tpu.memory_space<vmem>>, %arg18: memref<1x32xf32, #tpu.memory_space<vmem>>, %arg19: memref<1x32xf32, #tpu.memory_space<vmem>>, %arg20: memref<1x8x32xf32, #tpu.memory_space<vmem>>, %arg21: memref<1x4x8x8xbf16, #tpu.memory_space<vmem>>, %arg22: memref<8x32xbf16, #tpu.memory_space<vmem>>, %arg23: memref<8x32xbf16, #tpu.memory_space<vmem>>, %arg24: memref<8x32xbf16, #tpu.memory_space<vmem>>) attributes {dimension_semantics = [#tpu.dimension_semantics<parallel>, #tpu.dimension_semantics<arbitrary>], iteration_bounds = array<i64: 2, 1>, scalar_prefetch = 0 : i64, scratch_operands = 3 : i64, tpu.core_type = #tpu.core_type<tc>, window_params = [{transform_indices = @transform_0, window_bounds = array<i64: 1, 8, 32>}, {transform_indices = @transform_1, window_bounds = array<i64: 1, 4, 8, 8>}, {pipeline_mode = #tpu.pipeline_mode<synchronous>, transform_indices = @transform_2, window_bounds = array<i64: 32, 32>}, {pipeline_mode = #tpu.pipeline_mode<synchronous>, transform_indices = @transform_3, window_bounds = array<i64: 1, 32>}, {pipeline_mode = #tpu.pipeline_mode<synchronous>, transform_indices = @transform_4, window_bounds = array<i64: 32, 32>}, {pipeline_mode = #tpu.pipeline_mode<synchronous>, transform_indices = @transform_5, window_bounds = array<i64: 1, 32>}, {pipeline_mode = #tpu.pipeline_mode<synchronous>, transform_indices = @transform_6, window_bounds = array<i64: 32, 32>}, {pipeline_mode = #tpu.pipeline_mode<synchronous>, transform_indices = @transform_7, window_bounds = array<i64: 1, 32>}, {pipeline_mode = #tpu.pipeline_mode<synchronous>, transform_indices = @transform_8, window_bounds = array<i64: 32, 32>}, {pipeline_mode = #tpu.pipeline_mode<synchronous>, transform_indices = @transform_9, window_bounds = array<i64: 1, 32>}, {pipeline_mode = #tpu.pipeline_mode<synchronous>, transform_indices = @transform_10, window_bounds = array<i64: 1, 32>}, {pipeline_mode = #tpu.pipeline_mode<synchronous>, transform_indices = @transform_11, window_bounds = array<i64: 1, 32>}, {pipeline_mode = #tpu.pipeline_mode<synchronous>, transform_indices = @transform_12, window_bounds = array<i64: 32, 64>}, {pipeline_mode = #tpu.pipeline_mode<synchronous>, transform_indices = @transform_13, window_bounds = array<i64: 1, 64>}, {pipeline_mode = #tpu.pipeline_mode<synchronous>, transform_indices = @transform_14, window_bounds = array<i64: 64, 32>}, {pipeline_mode = #tpu.pipeline_mode<synchronous>, transform_indices = @transform_15, window_bounds = array<i64: 1, 32>}, {pipeline_mode = #tpu.pipeline_mode<synchronous>, transform_indices = @transform_16, window_bounds = array<i64: 1, 32>}, {pipeline_mode = #tpu.pipeline_mode<synchronous>, transform_indices = @transform_17, window_bounds = array<i64: 1, 32>}, {transform_indices = @transform_18, window_bounds = array<i64: 1, 8, 32>}, {transform_indices = @transform_19, window_bounds = array<i64: 1, 4, 8, 8>}]} {
    %c0_i32 = arith.constant 0 : i32
    %0 = arith.cmpi eq, %arg1, %c0_i32 : i32
    %1 = arith.extui %0 : i1 to i32
    %c0_i32_0 = arith.constant 0 : i32
    %2 = arith.cmpi ne, %1, %c0_i32_0 : i32
    scf.if %2 {
      %c0_108 = arith.constant 0 : index
      %c0_109 = arith.constant 0 : index
      %c0_110 = arith.constant 0 : index
      %201 = vector.load %arg2[%c0_108, %c0_109, %c0_110] : memref<1x8x32xf32, #tpu.memory_space<vmem>>, vector<1x8x32xf32>
      %202 = vector.shape_cast %201 : vector<1x8x32xf32> to vector<8x32xf32>
      %203 = arith.truncf %202 : vector<8x32xf32> to vector<8x32xbf16>
      %c0_111 = arith.constant 0 : index
      %c0_112 = arith.constant 0 : index
      %204 = vector.load %arg6[%c0_111, %c0_112] : memref<32x32xbf16, #tpu.memory_space<vmem>>, vector<32x32xbf16>
      %cst_113 = arith.constant dense<0.000000e+00> : vector<8x32xf32>
      %205 = tpu.matmul %203, %204, %cst_113 {dimension_numbers = #tpu.dot_dimension_numbers<[1], [0], [0], [1], [0, 0, 1, 1], [], []>} : vector<8x32xbf16>, vector<32x32xbf16>, vector<8x32xf32> -> vector<8x32xf32>
      %c0_114 = arith.constant 0 : index
      %c0_115 = arith.constant 0 : index
      %206 = vector.load %arg7[%c0_114, %c0_115] : memref<1x32xf32, #tpu.memory_space<vmem>>, vector<1x32xf32>
      %207 = vector.broadcast %206 : vector<1x32xf32> to vector<8x32xf32>
      %208 = arith.addf %205, %207 : vector<8x32xf32>
      %209 = arith.truncf %208 : vector<8x32xf32> to vector<8x32xbf16>
      %c0_116 = arith.constant 0 : index
      %c0_117 = arith.constant 0 : index
      %210 = vector.load %arg22[%c0_116, %c0_117] : memref<8x32xbf16, #tpu.memory_space<vmem>>, vector<8x32xbf16>
      tpu.vector_store %arg22[%c0_116, %c0_117], %209 {strides = array<i32>} : memref<8x32xbf16, #tpu.memory_space<vmem>>, vector<8x32xbf16>,
      %c0_118 = arith.constant 0 : index
      %c0_119 = arith.constant 0 : index
      %211 = vector.load %arg8[%c0_118, %c0_119] : memref<32x32xbf16, #tpu.memory_space<vmem>>, vector<32x32xbf16>
      %cst_120 = arith.constant dense<0.000000e+00> : vector<8x32xf32>
      %212 = tpu.matmul %203, %211, %cst_120 {dimension_numbers = #tpu.dot_dimension_numbers<[1], [0], [0], [1], [0, 0, 1, 1], [], []>} : vector<8x32xbf16>, vector<32x32xbf16>, vector<8x32xf32> -> vector<8x32xf32>
      %c0_121 = arith.constant 0 : index
      %c0_122 = arith.constant 0 : index
      %213 = vector.load %arg9[%c0_121, %c0_122] : memref<1x32xf32, #tpu.memory_space<vmem>>, vector<1x32xf32>
      %214 = vector.broadcast %213 : vector<1x32xf32> to vector<8x32xf32>
      %215 = arith.addf %212, %214 : vector<8x32xf32>
      %216 = arith.truncf %215 : vector<8x32xf32> to vector<8x32xbf16>
      %c0_123 = arith.constant 0 : index
      %c0_124 = arith.constant 0 : index
      %217 = vector.load %arg23[%c0_123, %c0_124] : memref<8x32xbf16, #tpu.memory_space<vmem>>, vector<8x32xbf16>
      tpu.vector_store %arg23[%c0_123, %c0_124], %216 {strides = array<i32>} : memref<8x32xbf16, #tpu.memory_space<vmem>>, vector<8x32xbf16>,
    } else {
    }
    %c0 = arith.constant 0 : index
    %c0_1 = arith.constant 0 : index
    %c0_2 = arith.constant 0 : index
    %3 = vector.load %arg2[%c0, %c0_1, %c0_2] : memref<1x8x32xf32, #tpu.memory_space<vmem>>, vector<1x8x32xf32>
    %4 = vector.shape_cast %3 : vector<1x8x32xf32> to vector<8x32xf32>
    %5 = arith.truncf %4 : vector<8x32xf32> to vector<8x32xbf16>
    %c0_3 = arith.constant 0 : index
    %c0_4 = arith.constant 0 : index
    %6 = vector.load %arg4[%c0_3, %c0_4] : memref<32x32xbf16, #tpu.memory_space<vmem>>, vector<32x32xbf16>
    %cst = arith.constant dense<0.000000e+00> : vector<8x32xf32>
    %7 = tpu.matmul %5, %6, %cst {dimension_numbers = #tpu.dot_dimension_numbers<[1], [0], [0], [1], [0, 0, 1, 1], [], []>} : vector<8x32xbf16>, vector<32x32xbf16>, vector<8x32xf32> -> vector<8x32xf32>
    %c0_5 = arith.constant 0 : index
    %c0_6 = arith.constant 0 : index
    %8 = vector.load %arg5[%c0_5, %c0_6] : memref<1x32xf32, #tpu.memory_space<vmem>>, vector<1x32xf32>
    %9 = vector.broadcast %8 : vector<1x32xf32> to vector<8x32xf32>
    %10 = arith.addf %7, %9 : vector<8x32xf32>
    %cst_7 = arith.constant 0.353553385 : f32
    %11 = vector.broadcast %cst_7 : f32 to vector<8x32xf32>
    %12 = arith.mulf %10, %11 : vector<8x32xf32>
    %13 = arith.truncf %12 : vector<8x32xf32> to vector<8x32xbf16>
    %c0_8 = arith.constant 0 : index
    %c0_9 = arith.constant 0 : index
    %14 = vector.load %arg22[%c0_8, %c0_9] : memref<8x32xbf16, #tpu.memory_space<vmem>>, vector<8x32xbf16>
    %c0_10 = arith.constant 0 : index
    %c0_11 = arith.constant 0 : index
    %15 = vector.load %arg23[%c0_10, %c0_11] : memref<8x32xbf16, #tpu.memory_space<vmem>>, vector<8x32xbf16>
    %16 = vector.extract_strided_slice %13 {offsets = [0, 0], sizes = [8, 8], strides = [1, 1]} : vector<8x32xbf16> to vector<8x8xbf16>
    %17 = vector.extract_strided_slice %14 {offsets = [0, 0], sizes = [8, 8], strides = [1, 1]} : vector<8x32xbf16> to vector<8x8xbf16>
    %cst_12 = arith.constant dense<0.000000e+00> : vector<8x8xf32>
    %18 = tpu.matmul %16, %17, %cst_12 {dimension_numbers = #tpu.dot_dimension_numbers<[1], [1], [0], [0], [0, 0, 1, 0], [], []>} : vector<8x8xbf16>, vector<8x8xbf16>, vector<8x8xf32> -> vector<8x8xf32>
    %c0_13 = arith.constant 0 : index
    %c0_14 = arith.constant 0 : index
    %c0_15 = arith.constant 0 : index
    %c0_16 = arith.constant 0 : index
    %19 = vector.load %arg3[%c0_13, %c0_14, %c0_15, %c0_16] : memref<1x4x8x8xi8, #tpu.memory_space<vmem>>, vector<1x1x8x8xi8>
    %20 = vector.shape_cast %19 : vector<1x1x8x8xi8> to vector<8x8xi8>
    %c0_i8 = arith.constant 0 : i8
    %21 = vector.broadcast %c0_i8 : i8 to vector<8x8xi8>
    %22 = arith.cmpi ne, %20, %21 : vector<8x8xi8>
    %cst_17 = arith.constant 1.000000e-10 : f32
    %23 = vector.broadcast %cst_17 : f32 to vector<8x8xf32>
    %24 = arith.select %22, %23, %18 : vector<8x8xi1>, vector<8x8xf32>
    %cst_18 = arith.constant dense<0xFF800000> : vector<8xf32>
    %25 = vector.multi_reduction <maximumf>, %24, %cst_18 [1] : vector<8x8xf32> to vector<8xf32>
    %26 = vector.shape_cast %25 : vector<8xf32> to vector<8x1xf32>
    %27 = vector.broadcast %26 : vector<8x1xf32> to vector<8x8xf32>
    %28 = arith.subf %24, %27 : vector<8x8xf32>
    %29 = math.exp %28 : vector<8x8xf32>
    %cst_19 = arith.constant dense<0.000000e+00> : vector<8xf32>
    %30 = vector.multi_reduction <add>, %29, %cst_19 [1] : vector<8x8xf32> to vector<8xf32>
    %31 = vector.shape_cast %30 : vector<8xf32> to vector<8x1xf32>
    %32 = tpu.reciprocal %31 {approx = true} : vector<8x1xf32> -> vector<8x1xf32>
    %33 = vector.broadcast %32 : vector<8x1xf32> to vector<8x8xf32>
    %34 = arith.mulf %29, %33 : vector<8x8xf32>
    %35 = arith.truncf %34 : vector<8x8xf32> to vector<8x8xbf16>
    %c0_20 = arith.constant 0 : index
    %c0_21 = arith.constant 0 : index
    %c0_22 = arith.constant 0 : index
    %c0_23 = arith.constant 0 : index
    %36 = vector.load %arg21[%c0_20, %c0_21, %c0_22, %c0_23] : memref<1x4x8x8xbf16, #tpu.memory_space<vmem>>, vector<1x1x8x8xbf16>
    %37 = vector.shape_cast %36 : vector<1x1x8x8xbf16> to vector<8x8xbf16>
    %38 = vector.shape_cast %35 : vector<8x8xbf16> to vector<1x1x8x8xbf16>
    tpu.vector_store %arg21[%c0_20, %c0_21, %c0_22, %c0_23], %38 {strides = array<i32>} : memref<1x4x8x8xbf16, #tpu.memory_space<vmem>>, vector<1x1x8x8xbf16>,
    %39 = arith.truncf %34 : vector<8x8xf32> to vector<8x8xbf16>
    %40 = vector.extract_strided_slice %15 {offsets = [0, 0], sizes = [8, 8], strides = [1, 1]} : vector<8x32xbf16> to vector<8x8xbf16>
    %cst_24 = arith.constant dense<0.000000e+00> : vector<8x8xf32>
    %41 = tpu.matmul %39, %40, %cst_24 {dimension_numbers = #tpu.dot_dimension_numbers<[1], [0], [0], [1], [0, 0, 1, 1], [], []>} : vector<8x8xbf16>, vector<8x8xbf16>, vector<8x8xf32> -> vector<8x8xf32>
    %42 = arith.truncf %41 : vector<8x8xf32> to vector<8x8xbf16>
    %c0_25 = arith.constant 0 : index
    %c0_26 = arith.constant 0 : index
    %43 = vector.load %arg24[%c0_25, %c0_26] : memref<8x32xbf16, #tpu.memory_space<vmem>>, vector<8x8xbf16>
    tpu.vector_store %arg24[%c0_25, %c0_26], %42 {strides = array<i32>} : memref<8x32xbf16, #tpu.memory_space<vmem>>, vector<8x8xbf16>,
    %44 = vector.extract_strided_slice %13 {offsets = [0, 8], sizes = [8, 8], strides = [1, 1]} : vector<8x32xbf16> to vector<8x8xbf16>
    %45 = vector.extract_strided_slice %14 {offsets = [0, 8], sizes = [8, 8], strides = [1, 1]} : vector<8x32xbf16> to vector<8x8xbf16>
    %cst_27 = arith.constant dense<0.000000e+00> : vector<8x8xf32>
    %46 = tpu.matmul %44, %45, %cst_27 {dimension_numbers = #tpu.dot_dimension_numbers<[1], [1], [0], [0], [0, 0, 1, 0], [], []>} : vector<8x8xbf16>, vector<8x8xbf16>, vector<8x8xf32> -> vector<8x8xf32>
    %c0_28 = arith.constant 0 : index
    %c1 = arith.constant 1 : index
    %c0_29 = arith.constant 0 : index
    %c0_30 = arith.constant 0 : index
    %47 = vector.load %arg3[%c0_28, %c1, %c0_29, %c0_30] : memref<1x4x8x8xi8, #tpu.memory_space<vmem>>, vector<1x1x8x8xi8>
    %48 = vector.shape_cast %47 : vector<1x1x8x8xi8> to vector<8x8xi8>
    %c0_i8_31 = arith.constant 0 : i8
    %49 = vector.broadcast %c0_i8_31 : i8 to vector<8x8xi8>
    %50 = arith.cmpi ne, %48, %49 : vector<8x8xi8>
    %cst_32 = arith.constant 1.000000e-10 : f32
    %51 = vector.broadcast %cst_32 : f32 to vector<8x8xf32>
    %52 = arith.select %50, %51, %46 : vector<8x8xi1>, vector<8x8xf32>
    %cst_33 = arith.constant dense<0xFF800000> : vector<8xf32>
    %53 = vector.multi_reduction <maximumf>, %52, %cst_33 [1] : vector<8x8xf32> to vector<8xf32>
    %54 = vector.shape_cast %53 : vector<8xf32> to vector<8x1xf32>
    %55 = vector.broadcast %54 : vector<8x1xf32> to vector<8x8xf32>
    %56 = arith.subf %52, %55 : vector<8x8xf32>
    %57 = math.exp %56 : vector<8x8xf32>
    %cst_34 = arith.constant dense<0.000000e+00> : vector<8xf32>
    %58 = vector.multi_reduction <add>, %57, %cst_34 [1] : vector<8x8xf32> to vector<8xf32>
    %59 = vector.shape_cast %58 : vector<8xf32> to vector<8x1xf32>
    %60 = tpu.reciprocal %59 {approx = true} : vector<8x1xf32> -> vector<8x1xf32>
    %61 = vector.broadcast %60 : vector<8x1xf32> to vector<8x8xf32>
    %62 = arith.mulf %57, %61 : vector<8x8xf32>
    %63 = arith.truncf %62 : vector<8x8xf32> to vector<8x8xbf16>
    %c0_35 = arith.constant 0 : index
    %c1_36 = arith.constant 1 : index
    %c0_37 = arith.constant 0 : index
    %c0_38 = arith.constant 0 : index
    %64 = vector.load %arg21[%c0_35, %c1_36, %c0_37, %c0_38] : memref<1x4x8x8xbf16, #tpu.memory_space<vmem>>, vector<1x1x8x8xbf16>
    %65 = vector.shape_cast %64 : vector<1x1x8x8xbf16> to vector<8x8xbf16>
    %66 = vector.shape_cast %63 : vector<8x8xbf16> to vector<1x1x8x8xbf16>
    tpu.vector_store %arg21[%c0_35, %c1_36, %c0_37, %c0_38], %66 {strides = array<i32>} : memref<1x4x8x8xbf16, #tpu.memory_space<vmem>>, vector<1x1x8x8xbf16>,
    %67 = arith.truncf %62 : vector<8x8xf32> to vector<8x8xbf16>
    %68 = vector.extract_strided_slice %15 {offsets = [0, 8], sizes = [8, 8], strides = [1, 1]} : vector<8x32xbf16> to vector<8x8xbf16>
    %cst_39 = arith.constant dense<0.000000e+00> : vector<8x8xf32>
    %69 = tpu.matmul %67, %68, %cst_39 {dimension_numbers = #tpu.dot_dimension_numbers<[1], [0], [0], [1], [0, 0, 1, 1], [], []>} : vector<8x8xbf16>, vector<8x8xbf16>, vector<8x8xf32> -> vector<8x8xf32>
    %70 = arith.truncf %69 : vector<8x8xf32> to vector<8x8xbf16>
    %c0_40 = arith.constant 0 : index
    %c8 = arith.constant 8 : index
    %71 = vector.load %arg24[%c0_40, %c8] : memref<8x32xbf16, #tpu.memory_space<vmem>>, vector<8x8xbf16>
    tpu.vector_store %arg24[%c0_40, %c8], %70 {strides = array<i32>} : memref<8x32xbf16, #tpu.memory_space<vmem>>, vector<8x8xbf16>,
    %72 = vector.extract_strided_slice %13 {offsets = [0, 16], sizes = [8, 8], strides = [1, 1]} : vector<8x32xbf16> to vector<8x8xbf16>
    %73 = vector.extract_strided_slice %14 {offsets = [0, 16], sizes = [8, 8], strides = [1, 1]} : vector<8x32xbf16> to vector<8x8xbf16>
    %cst_41 = arith.constant dense<0.000000e+00> : vector<8x8xf32>
    %74 = tpu.matmul %72, %73, %cst_41 {dimension_numbers = #tpu.dot_dimension_numbers<[1], [1], [0], [0], [0, 0, 1, 0], [], []>} : vector<8x8xbf16>, vector<8x8xbf16>, vector<8x8xf32> -> vector<8x8xf32>
    %c0_42 = arith.constant 0 : index
    %c2 = arith.constant 2 : index
    %c0_43 = arith.constant 0 : index
    %c0_44 = arith.constant 0 : index
    %75 = vector.load %arg3[%c0_42, %c2, %c0_43, %c0_44] : memref<1x4x8x8xi8, #tpu.memory_space<vmem>>, vector<1x1x8x8xi8>
    %76 = vector.shape_cast %75 : vector<1x1x8x8xi8> to vector<8x8xi8>
    %c0_i8_45 = arith.constant 0 : i8
    %77 = vector.broadcast %c0_i8_45 : i8 to vector<8x8xi8>
    %78 = arith.cmpi ne, %76, %77 : vector<8x8xi8>
    %cst_46 = arith.constant 1.000000e-10 : f32
    %79 = vector.broadcast %cst_46 : f32 to vector<8x8xf32>
    %80 = arith.select %78, %79, %74 : vector<8x8xi1>, vector<8x8xf32>
    %cst_47 = arith.constant dense<0xFF800000> : vector<8xf32>
    %81 = vector.multi_reduction <maximumf>, %80, %cst_47 [1] : vector<8x8xf32> to vector<8xf32>
    %82 = vector.shape_cast %81 : vector<8xf32> to vector<8x1xf32>
    %83 = vector.broadcast %82 : vector<8x1xf32> to vector<8x8xf32>
    %84 = arith.subf %80, %83 : vector<8x8xf32>
    %85 = math.exp %84 : vector<8x8xf32>
    %cst_48 = arith.constant dense<0.000000e+00> : vector<8xf32>
    %86 = vector.multi_reduction <add>, %85, %cst_48 [1] : vector<8x8xf32> to vector<8xf32>
    %87 = vector.shape_cast %86 : vector<8xf32> to vector<8x1xf32>
    %88 = tpu.reciprocal %87 {approx = true} : vector<8x1xf32> -> vector<8x1xf32>
    %89 = vector.broadcast %88 : vector<8x1xf32> to vector<8x8xf32>
    %90 = arith.mulf %85, %89 : vector<8x8xf32>
    %91 = arith.truncf %90 : vector<8x8xf32> to vector<8x8xbf16>
    %c0_49 = arith.constant 0 : index
    %c2_50 = arith.constant 2 : index
    %c0_51 = arith.constant 0 : index
    %c0_52 = arith.constant 0 : index
    %92 = vector.load %arg21[%c0_49, %c2_50, %c0_51, %c0_52] : memref<1x4x8x8xbf16, #tpu.memory_space<vmem>>, vector<1x1x8x8xbf16>
    %93 = vector.shape_cast %92 : vector<1x1x8x8xbf16> to vector<8x8xbf16>
    %94 = vector.shape_cast %91 : vector<8x8xbf16> to vector<1x1x8x8xbf16>
    tpu.vector_store %arg21[%c0_49, %c2_50, %c0_51, %c0_52], %94 {strides = array<i32>} : memref<1x4x8x8xbf16, #tpu.memory_space<vmem>>, vector<1x1x8x8xbf16>,
    %95 = arith.truncf %90 : vector<8x8xf32> to vector<8x8xbf16>
    %96 = vector.extract_strided_slice %15 {offsets = [0, 16], sizes = [8, 8], strides = [1, 1]} : vector<8x32xbf16> to vector<8x8xbf16>
    %cst_53 = arith.constant dense<0.000000e+00> : vector<8x8xf32>
    %97 = tpu.matmul %95, %96, %cst_53 {dimension_numbers = #tpu.dot_dimension_numbers<[1], [0], [0], [1], [0, 0, 1, 1], [], []>} : vector<8x8xbf16>, vector<8x8xbf16>, vector<8x8xf32> -> vector<8x8xf32>
    %98 = arith.truncf %97 : vector<8x8xf32> to vector<8x8xbf16>
    %c0_54 = arith.constant 0 : index
    %c16 = arith.constant 16 : index
    %99 = vector.load %arg24[%c0_54, %c16] : memref<8x32xbf16, #tpu.memory_space<vmem>>, vector<8x8xbf16>
    tpu.vector_store %arg24[%c0_54, %c16], %98 {strides = array<i32>} : memref<8x32xbf16, #tpu.memory_space<vmem>>, vector<8x8xbf16>,
    %100 = vector.extract_strided_slice %13 {offsets = [0, 24], sizes = [8, 8], strides = [1, 1]} : vector<8x32xbf16> to vector<8x8xbf16>
    %101 = vector.extract_strided_slice %14 {offsets = [0, 24], sizes = [8, 8], strides = [1, 1]} : vector<8x32xbf16> to vector<8x8xbf16>
    %cst_55 = arith.constant dense<0.000000e+00> : vector<8x8xf32>
    %102 = tpu.matmul %100, %101, %cst_55 {dimension_numbers = #tpu.dot_dimension_numbers<[1], [1], [0], [0], [0, 0, 1, 0], [], []>} : vector<8x8xbf16>, vector<8x8xbf16>, vector<8x8xf32> -> vector<8x8xf32>
    %c0_56 = arith.constant 0 : index
    %c3 = arith.constant 3 : index
    %c0_57 = arith.constant 0 : index
    %c0_58 = arith.constant 0 : index
    %103 = vector.load %arg3[%c0_56, %c3, %c0_57, %c0_58] : memref<1x4x8x8xi8, #tpu.memory_space<vmem>>, vector<1x1x8x8xi8>
    %104 = vector.shape_cast %103 : vector<1x1x8x8xi8> to vector<8x8xi8>
    %c0_i8_59 = arith.constant 0 : i8
    %105 = vector.broadcast %c0_i8_59 : i8 to vector<8x8xi8>
    %106 = arith.cmpi ne, %104, %105 : vector<8x8xi8>
    %cst_60 = arith.constant 1.000000e-10 : f32
    %107 = vector.broadcast %cst_60 : f32 to vector<8x8xf32>
    %108 = arith.select %106, %107, %102 : vector<8x8xi1>, vector<8x8xf32>
    %cst_61 = arith.constant dense<0xFF800000> : vector<8xf32>
    %109 = vector.multi_reduction <maximumf>, %108, %cst_61 [1] : vector<8x8xf32> to vector<8xf32>
    %110 = vector.shape_cast %109 : vector<8xf32> to vector<8x1xf32>
    %111 = vector.broadcast %110 : vector<8x1xf32> to vector<8x8xf32>
    %112 = arith.subf %108, %111 : vector<8x8xf32>
    %113 = math.exp %112 : vector<8x8xf32>
    %cst_62 = arith.constant dense<0.000000e+00> : vector<8xf32>
    %114 = vector.multi_reduction <add>, %113, %cst_62 [1] : vector<8x8xf32> to vector<8xf32>
    %115 = vector.shape_cast %114 : vector<8xf32> to vector<8x1xf32>
    %116 = tpu.reciprocal %115 {approx = true} : vector<8x1xf32> -> vector<8x1xf32>
    %117 = vector.broadcast %116 : vector<8x1xf32> to vector<8x8xf32>
    %118 = arith.mulf %113, %117 : vector<8x8xf32>
    %119 = arith.truncf %118 : vector<8x8xf32> to vector<8x8xbf16>
    %c0_63 = arith.constant 0 : index
    %c3_64 = arith.constant 3 : index
    %c0_65 = arith.constant 0 : index
    %c0_66 = arith.constant 0 : index
    %120 = vector.load %arg21[%c0_63, %c3_64, %c0_65, %c0_66] : memref<1x4x8x8xbf16, #tpu.memory_space<vmem>>, vector<1x1x8x8xbf16>
    %121 = vector.shape_cast %120 : vector<1x1x8x8xbf16> to vector<8x8xbf16>
    %122 = vector.shape_cast %119 : vector<8x8xbf16> to vector<1x1x8x8xbf16>
    tpu.vector_store %arg21[%c0_63, %c3_64, %c0_65, %c0_66], %122 {strides = array<i32>} : memref<1x4x8x8xbf16, #tpu.memory_space<vmem>>, vector<1x1x8x8xbf16>,
    %123 = arith.truncf %118 : vector<8x8xf32> to vector<8x8xbf16>
    %124 = vector.extract_strided_slice %15 {offsets = [0, 24], sizes = [8, 8], strides = [1, 1]} : vector<8x32xbf16> to vector<8x8xbf16>
    %cst_67 = arith.constant dense<0.000000e+00> : vector<8x8xf32>
    %125 = tpu.matmul %123, %124, %cst_67 {dimension_numbers = #tpu.dot_dimension_numbers<[1], [0], [0], [1], [0, 0, 1, 1], [], []>} : vector<8x8xbf16>, vector<8x8xbf16>, vector<8x8xf32> -> vector<8x8xf32>
    %126 = arith.truncf %125 : vector<8x8xf32> to vector<8x8xbf16>
    %c0_68 = arith.constant 0 : index
    %c24 = arith.constant 24 : index
    %127 = vector.load %arg24[%c0_68, %c24] : memref<8x32xbf16, #tpu.memory_space<vmem>>, vector<8x8xbf16>
    tpu.vector_store %arg24[%c0_68, %c24], %126 {strides = array<i32>} : memref<8x32xbf16, #tpu.memory_space<vmem>>, vector<8x8xbf16>,
    %c0_69 = arith.constant 0 : index
    %c0_70 = arith.constant 0 : index
    %128 = vector.load %arg24[%c0_69, %c0_70] : memref<8x32xbf16, #tpu.memory_space<vmem>>, vector<8x32xbf16>
    %c0_71 = arith.constant 0 : index
    %c0_72 = arith.constant 0 : index
    %129 = vector.load %arg10[%c0_71, %c0_72] : memref<32x32xbf16, #tpu.memory_space<vmem>>, vector<32x32xbf16>
    %cst_73 = arith.constant dense<0.000000e+00> : vector<8x32xf32>
    %130 = tpu.matmul %128, %129, %cst_73 {dimension_numbers = #tpu.dot_dimension_numbers<[1], [0], [0], [1], [0, 0, 1, 1], [], []>} : vector<8x32xbf16>, vector<32x32xbf16>, vector<8x32xf32> -> vector<8x32xf32>
    %c0_74 = arith.constant 0 : index
    %c0_75 = arith.constant 0 : index
    %131 = vector.load %arg11[%c0_74, %c0_75] : memref<1x32xf32, #tpu.memory_space<vmem>>, vector<1x32xf32>
    %132 = vector.broadcast %131 : vector<1x32xf32> to vector<8x32xf32>
    %133 = arith.addf %130, %132 : vector<8x32xf32>
    %134 = arith.addf %4, %133 : vector<8x32xf32>
    %cst_76 = arith.constant dense<0.000000e+00> : vector<8xf32>
    %135 = vector.multi_reduction <add>, %134, %cst_76 [1] : vector<8x32xf32> to vector<8xf32>
    %136 = vector.shape_cast %135 : vector<8xf32> to vector<8x1xf32>
    %cst_77 = arith.constant 3.200000e+01 : f32
    %137 = vector.broadcast %cst_77 : f32 to vector<8x1xf32>
    %138 = arith.divf %136, %137 : vector<8x1xf32>
    %139 = vector.broadcast %138 : vector<8x1xf32> to vector<8x32xf32>
    %140 = arith.subf %134, %139 : vector<8x32xf32>
    %141 = arith.mulf %140, %140 : vector<8x32xf32>
    %cst_78 = arith.constant dense<0.000000e+00> : vector<8xf32>
    %142 = vector.multi_reduction <add>, %141, %cst_78 [1] : vector<8x32xf32> to vector<8xf32>
    %143 = vector.shape_cast %142 : vector<8xf32> to vector<8x1xf32>
    %cst_79 = arith.constant 3.200000e+01 : f32
    %144 = vector.broadcast %cst_79 : f32 to vector<8x1xf32>
    %145 = arith.divf %143, %144 : vector<8x1xf32>
    %146 = vector.broadcast %138 : vector<8x1xf32> to vector<8x32xf32>
    %147 = arith.subf %134, %146 : vector<8x32xf32>
    %cst_80 = arith.constant 9.99999974E-6 : f32
    %148 = vector.broadcast %cst_80 : f32 to vector<8x1xf32>
    %149 = arith.addf %145, %148 : vector<8x1xf32>
    %150 = math.rsqrt %149 : vector<8x1xf32>
    %151 = vector.broadcast %150 : vector<8x1xf32> to vector<8x32xf32>
    %152 = arith.mulf %147, %151 : vector<8x32xf32>
    %c0_81 = arith.constant 0 : index
    %c0_82 = arith.constant 0 : index
    %153 = vector.load %arg12[%c0_81, %c0_82] : memref<1x32xf32, #tpu.memory_space<vmem>>, vector<1x32xf32>
    %154 = vector.broadcast %153 : vector<1x32xf32> to vector<8x32xf32>
    %155 = arith.mulf %152, %154 : vector<8x32xf32>
    %c0_83 = arith.constant 0 : index
    %c0_84 = arith.constant 0 : index
    %156 = vector.load %arg13[%c0_83, %c0_84] : memref<1x32xf32, #tpu.memory_space<vmem>>, vector<1x32xf32>
    %157 = vector.broadcast %156 : vector<1x32xf32> to vector<8x32xf32>
    %158 = arith.addf %155, %157 : vector<8x32xf32>
    %159 = arith.truncf %158 : vector<8x32xf32> to vector<8x32xbf16>
    %c0_85 = arith.constant 0 : index
    %c0_86 = arith.constant 0 : index
    %160 = vector.load %arg14[%c0_85, %c0_86] : memref<32x64xbf16, #tpu.memory_space<vmem>>, vector<32x64xbf16>
    %cst_87 = arith.constant dense<0.000000e+00> : vector<8x64xf32>
    %161 = tpu.matmul %159, %160, %cst_87 {dimension_numbers = #tpu.dot_dimension_numbers<[1], [0], [0], [1], [0, 0, 1, 1], [], []>} : vector<8x32xbf16>, vector<32x64xbf16>, vector<8x64xf32> -> vector<8x64xf32>
    %c0_88 = arith.constant 0 : index
    %c0_89 = arith.constant 0 : index
    %162 = vector.load %arg15[%c0_88, %c0_89] : memref<1x64xf32, #tpu.memory_space<vmem>>, vector<1x64xf32>
    %163 = vector.broadcast %162 : vector<1x64xf32> to vector<8x64xf32>
    %164 = arith.addf %161, %163 : vector<8x64xf32>
    %cst_90 = arith.constant 0.000000e+00 : f32
    %165 = vector.broadcast %cst_90 : f32 to vector<8x64xf32>
    %166 = arith.maximumf %164, %165 : vector<8x64xf32>
    %167 = arith.truncf %166 : vector<8x64xf32> to vector<8x64xbf16>
    %c0_91 = arith.constant 0 : index
    %c0_92 = arith.constant 0 : index
    %168 = vector.load %arg16[%c0_91, %c0_92] : memref<64x32xbf16, #tpu.memory_space<vmem>>, vector<64x32xbf16>
    %cst_93 = arith.constant dense<0.000000e+00> : vector<8x32xf32>
    %169 = tpu.matmul %167, %168, %cst_93 {dimension_numbers = #tpu.dot_dimension_numbers<[1], [0], [0], [1], [0, 0, 1, 1], [], []>} : vector<8x64xbf16>, vector<64x32xbf16>, vector<8x32xf32> -> vector<8x32xf32>
    %c0_94 = arith.constant 0 : index
    %c0_95 = arith.constant 0 : index
    %170 = vector.load %arg17[%c0_94, %c0_95] : memref<1x32xf32, #tpu.memory_space<vmem>>, vector<1x32xf32>
    %171 = vector.broadcast %170 : vector<1x32xf32> to vector<8x32xf32>
    %172 = arith.addf %169, %171 : vector<8x32xf32>
    %173 = arith.addf %158, %172 : vector<8x32xf32>
    %cst_96 = arith.constant dense<0.000000e+00> : vector<8xf32>
    %174 = vector.multi_reduction <add>, %173, %cst_96 [1] : vector<8x32xf32> to vector<8xf32>
    %175 = vector.shape_cast %174 : vector<8xf32> to vector<8x1xf32>
    %cst_97 = arith.constant 3.200000e+01 : f32
    %176 = vector.broadcast %cst_97 : f32 to vector<8x1xf32>
    %177 = arith.divf %175, %176 : vector<8x1xf32>
    %178 = vector.broadcast %177 : vector<8x1xf32> to vector<8x32xf32>
    %179 = arith.subf %173, %178 : vector<8x32xf32>
    %180 = arith.mulf %179, %179 : vector<8x32xf32>
    %cst_98 = arith.constant dense<0.000000e+00> : vector<8xf32>
    %181 = vector.multi_reduction <add>, %180, %cst_98 [1] : vector<8x32xf32> to vector<8xf32>
    %182 = vector.shape_cast %181 : vector<8xf32> to vector<8x1xf32>
    %cst_99 = arith.constant 3.200000e+01 : f32
    %183 = vector.broadcast %cst_99 : f32 to vector<8x1xf32>
    %184 = arith.divf %182, %183 : vector<8x1xf32>
    %185 = vector.broadcast %177 : vector<8x1xf32> to vector<8x32xf32>
    %186 = arith.subf %173, %185 : vector<8x32xf32>
    %cst_100 = arith.constant 9.99999974E-6 : f32
    %187 = vector.broadcast %cst_100 : f32 to vector<8x1xf32>
    %188 = arith.addf %184, %187 : vector<8x1xf32>
    %189 = math.rsqrt %188 : vector<8x1xf32>
    %190 = vector.broadcast %189 : vector<8x1xf32> to vector<8x32xf32>
    %191 = arith.mulf %186, %190 : vector<8x32xf32>
    %c0_101 = arith.constant 0 : index
    %c0_102 = arith.constant 0 : index
    %192 = vector.load %arg18[%c0_101, %c0_102] : memref<1x32xf32, #tpu.memory_space<vmem>>, vector<1x32xf32>
    %193 = vector.broadcast %192 : vector<1x32xf32> to vector<8x32xf32>
    %194 = arith.mulf %191, %193 : vector<8x32xf32>
    %c0_103 = arith.constant 0 : index
    %c0_104 = arith.constant 0 : index
    %195 = vector.load %arg19[%c0_103, %c0_104] : memref<1x32xf32, #tpu.memory_space<vmem>>, vector<1x32xf32>
    %196 = vector.broadcast %195 : vector<1x32xf32> to vector<8x32xf32>
    %197 = arith.addf %194, %196 : vector<8x32xf32>
    %c0_105 = arith.constant 0 : index
    %c0_106 = arith.constant 0 : index
    %c0_107 = arith.constant 0 : index
    %198 = vector.load %arg20[%c0_105, %c0_106, %c0_107] : memref<1x8x32xf32, #tpu.memory_space<vmem>>, vector<1x8x32xf32>
    %199 = vector.shape_cast %198 : vector<1x8x32xf32> to vector<8x32xf32>
    %200 = vector.shape_cast %197 : vector<8x32xf32> to vector<1x8x32xf32>
    tpu.vector_store %arg20[%c0_105, %c0_106, %c0_107], %200 {strides = array<i32>} : memref<1x8x32xf32, #tpu.memory_space<vmem>>, vector<1x8x32xf32>,
    return
  }
  func.func @transform_0(%arg0: i32, %arg1: i32) -> (i32, i32, i32) {
    %c0_i32 = arith.constant 0 : i32
    %c0_i32_0 = arith.constant 0 : i32
    %c0_i32_1 = arith.constant 0 : i32
    return %arg0, %c0_i32, %c0_i32_0 : i32, i32, i32
  }
  func.func @transform_1(%arg0: i32, %arg1: i32) -> (i32, i32, i32, i32) {
    %c0_i32 = arith.constant 0 : i32
    %c0_i32_0 = arith.constant 0 : i32
    %c0_i32_1 = arith.constant 0 : i32
    return %arg0, %c0_i32, %arg1, %c0_i32_0 : i32, i32, i32, i32
  }
  func.func @transform_2(%arg0: i32, %arg1: i32) -> (i32, i32) {
    %c0_i32 = arith.constant 0 : i32
    %c0_i32_0 = arith.constant 0 : i32
    %c0_i32_1 = arith.constant 0 : i32
    return %c0_i32, %c0_i32_0 : i32, i32
  }
  func.func @transform_3(%arg0: i32, %arg1: i32) -> (i32, i32) {
    %c0_i32 = arith.constant 0 : i32
    %c0_i32_0 = arith.constant 0 : i32
    %c0_i32_1 = arith.constant 0 : i32
    return %c0_i32, %c0_i32_0 : i32, i32
  }
  func.func @transform_4(%arg0: i32, %arg1: i32) -> (i32, i32) {
    %c0_i32 = arith.constant 0 : i32
    %c0_i32_0 = arith.constant 0 : i32
    %c0_i32_1 = arith.constant 0 : i32
    return %c0_i32, %c0_i32_0 : i32, i32
  }
  func.func @transform_5(%arg0: i32, %arg1: i32) -> (i32, i32) {
    %c0_i32 = arith.constant 0 : i32
    %c0_i32_0 = arith.constant 0 : i32
    %c0_i32_1 = arith.constant 0 : i32
    return %c0_i32, %c0_i32_0 : i32, i32
  }
  func.func @transform_6(%arg0: i32, %arg1: i32) -> (i32, i32) {
    %c0_i32 = arith.constant 0 : i32
    %c0_i32_0 = arith.constant 0 : i32
    %c0_i32_1 = arith.constant 0 : i32
    return %c0_i32, %c0_i32_0 : i32, i32
  }
  func.func @transform_7(%arg0: i32, %arg1: i32) -> (i32, i32) {
    %c0_i32 = arith.constant 0 : i32
    %c0_i32_0 = arith.constant 0 : i32
    %c0_i32_1 = arith.constant 0 : i32
    return %c0_i32, %c0_i32_0 : i32, i32
  }
  func.func @transform_8(%arg0: i32, %arg1: i32) -> (i32, i32) {
    %c0_i32 = arith.constant 0 : i32
    %c0_i32_0 = arith.constant 0 : i32
    %c0_i32_1 = arith.constant 0 : i32
    return %c0_i32, %c0_i32_0 : i32, i32
  }
  func.func @transform_9(%arg0: i32, %arg1: i32) -> (i32, i32) {
    %c0_i32 = arith.constant 0 : i32
    %c0_i32_0 = arith.constant 0 : i32
    %c0_i32_1 = arith.constant 0 : i32
    return %c0_i32, %c0_i32_0 : i32, i32
  }
  func.func @transform_10(%arg0: i32, %arg1: i32) -> (i32, i32) {
    %c0_i32 = arith.constant 0 : i32
    %c0_i32_0 = arith.constant 0 : i32
    %c0_i32_1 = arith.constant 0 : i32
    return %c0_i32, %c0_i32_0 : i32, i32
  }
  func.func @transform_11(%arg0: i32, %arg1: i32) -> (i32, i32) {
    %c0_i32 = arith.constant 0 : i32
    %c0_i32_0 = arith.constant 0 : i32
    %c0_i32_1 = arith.constant 0 : i32
    return %c0_i32, %c0_i32_0 : i32, i32
  }
  func.func @transform_12(%arg0: i32, %arg1: i32) -> (i32, i32) {
    %c0_i32 = arith.constant 0 : i32
    %c0_i32_0 = arith.constant 0 : i32
    %c0_i32_1 = arith.constant 0 : i32
    return %c0_i32, %c0_i32_0 : i32, i32
  }
  func.func @transform_13(%arg0: i32, %arg1: i32) -> (i32, i32) {
    %c0_i32 = arith.constant 0 : i32
    %c0_i32_0 = arith.constant 0 : i32
    %c0_i32_1 = arith.constant 0 : i32
    return %c0_i32, %c0_i32_0 : i32, i32
  }
  func.func @transform_14(%arg0: i32, %arg1: i32) -> (i32, i32) {
    %c0_i32 = arith.constant 0 : i32
    %c0_i32_0 = arith.constant 0 : i32
    %c0_i32_1 = arith.constant 0 : i32
    return %c0_i32, %c0_i32_0 : i32, i32
  }
  func.func @transform_15(%arg0: i32, %arg1: i32) -> (i32, i32) {
    %c0_i32 = arith.constant 0 : i32
    %c0_i32_0 = arith.constant 0 : i32
    %c0_i32_1 = arith.constant 0 : i32
    return %c0_i32, %c0_i32_0 : i32, i32
  }
  func.func @transform_16(%arg0: i32, %arg1: i32) -> (i32, i32) {
    %c0_i32 = arith.constant 0 : i32
    %c0_i32_0 = arith.constant 0 : i32
    %c0_i32_1 = arith.constant 0 : i32
    return %c0_i32, %c0_i32_0 : i32, i32
  }
  func.func @transform_17(%arg0: i32, %arg1: i32) -> (i32, i32) {
    %c0_i32 = arith.constant 0 : i32
    %c0_i32_0 = arith.constant 0 : i32
    %c0_i32_1 = arith.constant 0 : i32
    return %c0_i32, %c0_i32_0 : i32, i32
  }
  func.func @transform_18(%arg0: i32, %arg1: i32) -> (i32, i32, i32) {
    %c0_i32 = arith.constant 0 : i32
    %c0_i32_0 = arith.constant 0 : i32
    return %arg0, %arg1, %c0_i32 : i32, i32, i32
  }
  func.func @transform_19(%arg0: i32, %arg1: i32) -> (i32, i32, i32, i32) {
    %c0_i32 = arith.constant 0 : i32
    %c0_i32_0 = arith.constant 0 : i32
    %c0_i32_1 = arith.constant 0 : i32
    return %arg0, %c0_i32, %arg1, %c0_i32_0 : i32, i32, i32, i32
  }
}

</mosaic_0001>

<bundles_post_ra>
// kernel: tpu_custom_call.1
= control target key start
LH: loop header
LB: loop body
LE: loop exit
PB: predicated region body
PF: predicated region fallthrough
CT: control target
= control target key end

     0   :  { %s3012_s0 = inlined_call_operand.vmem [shape: f32[2,8,32], index: 0, kind: input, shape index: {}]   ;;  %s3013_s1 = inlined_call_operand.vmem [shape: s8[2,4,8,8], index: 1, kind: input, shape index: {}]   ;;  %s3014_s2 = inlined_call_operand.vmem [shape: bf16[32,32], index: 2, kind: input, shape index: {}]   ;;  %s3015_s3 = inlined_call_operand.vmem [shape: f32[1,32], index: 3, kind: input, shape index: {}]   ;;  %s3016_s4 = inlined_call_operand.hbm [shape: bf16[32,32], index: 4, kind: input, shape index: {}]   ;;  %s3017_s5 = inlined_call_operand.vmem [shape: f32[1,32], index: 5, kind: input, shape index: {}]   ;;  %s3018_s6 = inlined_call_operand.hbm [shape: bf16[32,32], index: 6, kind: input, shape index: {}]   ;;  %s3019_s7 = inlined_call_operand.vmem [shape: f32[1,32], index: 7, kind: input, shape index: {}]   ;;  %s3020_s8 = inlined_call_operand.hbm [shape: bf16[32,32], index: 8, kind: input, shape index: {}]   ;;  %s3021_s9 = inlined_call_operand.vmem [shape: f32[1,32], index: 9, kind: input, shape index: {}]   ;;  %s3022_s10 = inlined_call_operand.vmem [shape: f32[1,32], index: 10, kind: input, shape index: {}]   ;;  %s3023_s11 = inlined_call_operand.vmem [shape: f32[1,32], index: 11, kind: input, shape index: {}]   ;;  %s3024_s12 = inlined_call_operand.hbm [shape: bf16[32,64], index: 12, kind: input, shape index: {}]   ;;  %s3025_s13 = inlined_call_operand.vmem [shape: f32[1,64], index: 13, kind: input, shape index: {}]   ;;  %s3026_s14 = inlined_call_operand.vmem [shape: bf16[64,32], index: 14, kind: input, shape index: {}]   ;;  %s3027_s15 = inlined_call_operand.vmem [shape: f32[1,32], index: 15, kind: input, shape index: {}]   ;;  %s3028_s16 = inlined_call_operand.vmem [shape: f32[1,32], index: 16, kind: input, shape index: {}]   ;;  %s3029_s17 = inlined_call_operand.vmem [shape: f32[1,32], index: 17, kind: input, shape index: {}]   ;;  %s3030_s18 = inlined_call_operand.hbm [shape: f32[2,8,32], index: 18, kind: output, shape index: {0}]   ;;  %s3031_s19 = inlined_call_operand.hbm [shape: bf16[2,4,8,8], index: 19, kind: output, shape index: {1}]  }
   0x1   :  { %3041 = sst [smem:[#allocation28_spill]] %s3012_s0 }
   0x2   :  { %3042 = sst [smem:[#allocation29_spill]] %s3013_s1 }
   0x3   :  { %3043 = sst [smem:[#allocation30_spill]] %s3014_s2 }
   0x4   :  { %3044 = sst [smem:[#allocation31_spill]] %s3015_s3 }
   0x5   :  { %3045 = sst [smem:[#allocation32_spill]] %s3016_s4 }
   0x6   :  { %3046 = sst [smem:[#allocation33_spill]] %s3017_s5 }
   0x7   :  { %3047 = sst [smem:[#allocation34_spill]] %s3018_s6 }
   0x8   :  { %3048 = sst [smem:[#allocation35_spill]] %s3030_s18 }
   0x9   :  { %25 = vsyncpa [#allocation6], 0 }
   0xa   :  { %26 = vsyncpa [#allocation9], 0 }
   0xb   :  { %27 = vsyncpa [#allocation12], 0 }
   0xc   :  { %28 = vsyncpa [#allocation7], 0 }
   0xd   :  { %30 = vsyncpa [#allocation7 + $0x1], 0 }
   0xe   :  { %31 = vsyncpa [#allocation15], 0 }
   0xf   :  { %33 = vsyncpa [#allocation15 + $0x1], 0  ;;  %s2626_s0 = smov 0   ;;  %s2628_s30 = smov 0  }
  0x10   :  { %s2630_s20 = smov 0   ;;  %s2632_s21 = smov 0  }
  0x11   :  { %s2634_s1 = smov 0   ;;  %s2636_s22 = smov 0  }
  0x12 LB: > { %3049 = sst [smem:[#allocation21_spill]] %s2485_s0  ;;  %s1918_s2 = sadd.s32 4294967295, %s2505_s22   ;;  %s2505_s22 = sphi %s2636_s22, %s39_s22   ;;  %s2501_s1 = sphi %s2634_s1, %s3076_s1   ;;  %s2497_s21 = sphi %s2632_s21, %s3075_s21   ;;  %s2493_s20 = sphi %s2630_s20, %s3074_s20   ;;  %s2489_s30 = sphi %s2628_s30, %s3078_s30   ;;  %s2485_s0 = sphi %s2626_s0, %s3077_s0  }
  0x13   : > { %3050 = sst [smem:[#allocation22_spill]] %s2493_s20  ;;  %s1919_s23 = sadd.s32 4294967294, %s2505_s22  }
  0x14   : > { %3051 = sst [smem:[#allocation23_spill]] %s2501_s1  ;;  %s51_s24 = sadd.s32 1, %s2501_s1 }
  0x15   : > { %3052 = sst [smem:[#allocation24_spill]] %s2505_s22  ;;  %s450_s25 = sadd.s32 1, %s2493_s20 }
  0x16   : > { %p53_p0 = scmp.ge.s32.totalorder %s51_s24, 2  ;;  %p460_p1 = scmp.ne.s32.totalorder %s2493_s20, %s2489_s30 }
  0x17   : > { %p461_p2 = scmp.eq.s32.totalorder %s1918_s2, 1  ;;  %p466_p3 = scmp.ne.s32.totalorder %s2489_s30, %s2485_s0 }
  0x18   : > { %s3080_s24 = smov (%p53_p0, %s51_s24), 0  ;;  %p467_p5 = scmp.eq.s32.totalorder %s1919_s23, 1 }
  0x19   : > { %3053 = sst [smem:[#allocation25_spill]] %s3080_s24  ;;  %p2666_p4 = por %p461_p2, %p460_p1 }
  0x1a   : > { %s445_s26 = ssub.s32 %s2501_s1, %s3080_s24  ;;  %p1920_p6 = scmp.ge.s32.totalorder %s2505_s22, 1 }
  0x1b   : > { %p448_p7 = scmp.eq.s32.totalorder %s445_s26, 0  ;;  %p2673_p8 = por %p467_p5, %p466_p3 }
  0x1c   : > { %p502_p9 = scmp.lt.s32.totalorder %s2505_s22, 3  ;;  %p2685_p11 = scmp.eq.s32.totalorder %s1918_s2, 0 }
  0x1d   : > { %s3055_s27 = scalar_select %p2673_p8, 1, 0 }
  0x1e   : > { %s2679_s28 = scalar_select %p448_p7, %s2493_s20, %s450_s25  }
  0x1f   : > { %3056 = sst [smem:[#allocation26_spill]] %s3055_s27  ;;  %p2681_p10 = pnand %p1920_p6, %p502_p9 }
  0x20   : > { %3057 = sst [smem:[#allocation27_spill]] %s2679_s28  ;;  %s2507_s23 = smov [#allocation8]  }
  0x21   : > { %p2153_p12 = pneg %p2681_p10  ;;  %s536_s26 = sshll.u32 %s2507_s23, 4  ;;  %s537_s26 = int_to_ptr.vmem [resolvable:$true] %s536_s26 }
  0x22   : > { %s2508_s25 = smov [#allocation5]   ;;  %s2294_s2 = scalar_lea.vmem %s537_s26, 256 }
  0x23   : > { %p2693_p13 = pnand %p2685_p11, %p2153_p12  ;;  %s520_s1 = sshll.u32 %s2508_s25, 4  ;;  %s521_s1 = int_to_ptr.vmem [resolvable:$true] %s520_s1 }
  0x24   : > { %p2295_p1 = scmp.ne.s32.totalorder %s537_s26, %s2294_s2  ;;  %p2302_p5 = scmp.lt.s32.totalorder %s537_s26, %s537_s26 }
  0x25   : > { %p2285_p0 = pneg %p2693_p13  ;;  %p2303_p6 = scmp.lt.s32.totalorder %s2294_s2, %s2294_s2 }
  0x27   : > { %p2297_p2 = pnand %p2295_p1, %p2285_p0  ;;  %p2304_p7 = por %p2303_p6, %p2302_p5 }
  0x29   : > { %p2298_p3 = pneg %p2297_p2 }
  0x2b   : > { %p2305_p9 = pnand %p2304_p7, %p2298_p3 }
  0x2d   : > { %2308 = shalt.err (!%p2305_p9)
}
  0x2e   : > { %s2509_s23 = smov 64   ;;  %s2510_s28 = smov 4  }
  0x2f   : > { %s3061_s6 = sld [smem:[#allocation34_spill]]  ;;  %s2320_s27 = scalar_lea.vmem %s521_s1, 256 }
  0x30   : > { %p2321_p12 = scmp.ne.s32.totalorder %s521_s1, %s2320_s27  ;;  %p2328_p3 = scmp.lt.s32.totalorder %s521_s1, %s521_s1 }
  0x31   : > { %p2329_p5 = scmp.lt.s32.totalorder %s2320_s27, %s2320_s27 }
  0x32   : > { %p2323_p1 = pnand %p2321_p12, %p2285_p0 }
  0x33   : > { %p2330_p6 = por %p2329_p5, %p2328_p3 }
  0x34   : > { %p2324_p2 = pneg %p2323_p1 }
  0x35   : > { %2159 = dma.hbm_to_vmem [thread:$0]  (!%p2693_p13), %s3061_s6, 256, %s537_s26, [#allocation9], %s2509_s23, %s2509_s23, %s2510_s28  }
  0x36   : > { %p2331_p7 = pnand %p2330_p6, %p2324_p2 }
  0x38   : > { %2334 = shalt.err (!%p2331_p7)
}
  0x39   : > { %s3062_s4 = sld [smem:[#allocation32_spill]]  ;;  %s2511_s26 = smov [#allocation10]  }
  0x3a   : > { %s552_s25 = sshll.u32 %s2511_s26, 4  ;;  %s2512_s6 = smov [#allocation11]   ;;  %s553_s25 = int_to_ptr.vmem [resolvable:$true] %s552_s25 }
  0x3b   : > { %s574_s22 = sshll.u32 %s2512_s6, 4  ;;  %s2346_s18 = scalar_lea.vmem %s553_s25, 256  ;;  %s575_s22 = int_to_ptr.vmem [resolvable:$true] %s574_s22 }
  0x3c   : > { %p2347_p9 = scmp.ne.s32.totalorder %s553_s25, %s2346_s18  ;;  %p2354_p2 = scmp.lt.s32.totalorder %s553_s25, %s553_s25 }
  0x3d   : > { %p2355_p3 = scmp.lt.s32.totalorder %s2346_s18, %s2346_s18 }
  0x3e   : > { %p2349_p12 = pnand %p2347_p9, %p2285_p0 }
  0x3f   : > { %2156 = dma.hbm_to_vmem [thread:$0]  (!%p2693_p13), %s3062_s4, 256, %s521_s1, [#allocation6], %s2509_s23, %s2509_s23, %s2510_s28  }
  0x40   : > { %p2350_p1 = pneg %p2349_p12  ;;  %p2356_p5 = por %p2355_p3, %p2354_p2 }
  0x42   : > { %p2357_p6 = pnand %p2356_p5, %p2350_p1 }
  0x44   : > { %2360 = shalt.err (!%p2357_p6)
}
  0x45   : > { %2162 = dma.hbm_to_vmem [thread:$0]  (!%p2693_p13), %s3020_s8, 256, %s553_s25, [#allocation9], %s2509_s23, %s2509_s23, %s2510_s28  }
  0x46   : > { %s2372_s6 = scalar_lea.vmem %s575_s22, 256  ;;  %p2380_p2 = scmp.lt.s32.totalorder %s575_s22, %s575_s22 }
  0x47   : > { %p2373_p7 = scmp.ne.s32.totalorder %s575_s22, %s2372_s6  ;;  %p2381_p1 = scmp.lt.s32.totalorder %s2372_s6, %s2372_s6 }
  0x49   : > { %p2375_p9 = pnand %p2373_p7, %p2285_p0  ;;  %p2382_p3 = por %p2381_p1, %p2380_p2 }
  0x4b   : > { %p2376_p12 = pneg %p2375_p9 }
  0x4d   : > { %p2383_p5 = pnand %p2382_p3, %p2376_p12 }
  0x4f   : > { %2386 = shalt.err (!%p2383_p5)
}
  0x50   : > { %2165 = dma.hbm_to_vmem [thread:$0]  (!%p2693_p13), %s3024_s12, 256, %s575_s22, [#allocation12], %s2509_s23, %s2509_s23, %s2510_s28  }
  0x51   : > { %623 = sbr.rel (%p2681_p10) target bundleno = 2497 (0x9c1), region = 92 }
  0x56   : > { %2464 = dma.done.wait (%p2685_p11), [#allocation6], 256  }
  0x57   : > { %2466 = vsyncadd (%p2685_p11), [#allocation6], 4294967040 }
  0x58   : > { %2468 = dma.done.wait (%p2685_p11), [#allocation9], 512  }
  0x59   : > { %2470 = vsyncadd (%p2685_p11), [#allocation9], 4294966784 }
  0x5a   : > { %2472 = dma.done.wait (%p2685_p11), [#allocation12], 256  }
  0x5b   : > { %2474 = vsyncadd (%p2685_p11), [#allocation12], 4294967040  ;;  %p703_p10 = scmp.lt.s32.totalorder %s2497_s21, 1  ;;  %v2513_v0 = vmov 0.0   ;;  %vm2514_vm0 = vmmov 0   ;;  %s3063_s29 = sld [smem:[#allocation28_spill]] }
  0x5c   : > { %2033 = vmatprep.subr.bf16.mxu0 %v2513_v0  ;;  %2037 = vmatprep.mubr.msk.bf16.mxu0 %vm2514_vm0, %v2513_v0  ;;  %v2247_v1 = vld [vmem:[#allocation5 + $0x8] sm:$0xff]   ;;  %v2248_v2 = vld [vmem:[#allocation5] sm:$0xff]   ;;  %vm747_vm1 = vcmask 261120   ;;  %s3064_s25 = sld [smem:[#allocation30_spill]]  ;;  %v2251_v7 = vld [vmem:[#allocation8 + $0x8] sm:$0xff]   ;;  %vm792_vm2 = vcmask 257024  }
  0x5d   : > { %s2762_s22 = scalar_select %p703_p10, %s2497_s21, 1  ;;  %2041 = vmatprep.subr.bf16.mxu1 %v2513_v0  ;;  %2045 = vmatprep.mubr.msk.bf16.mxu1 %vm2514_vm0, %v2513_v0  ;;  %v2252_v8 = vld [vmem:[#allocation8] sm:$0xff]   ;;  %vm932_vm3 = vcmask 64512   ;;  %vm1002_vm4 = vcmask 1043456   ;;  %v2518_v46 = vmov 0   ;;  %vm997_vm13 = vcmask 60416  }
  0x5e   : > { %2034 = vmatpush3.bf16.msra.mxu0 %v2247_v1  ;;  %2042 = vmatpush3.bf16.msra.mxu1 %v2251_v7  ;;  %s3065_s5 = sld [smem:[#allocation33_spill]]  ;;  %s2517_s20 = smov 104   ;;  %v1940_v27 = vld [vmem:[%s3019_s7] ss:$0 sm:$0xff]  ;;  %vm1181_vm14 = vcmask 126016   ;;  %vm1309_vm15 = vcmask 191616  }
  0x5f   : > { %s1933_s0 = sshll.u32 %s2762_s22, 3  ;;  %2035 = vmatprep.subr.bf16.mxu0 %v2513_v0  ;;  %2043 = vmatprep.subr.bf16.mxu1 %v2513_v0  ;;  %s3066_s28 = sld [smem:[#allocation31_spill]] }
  0x60   : > { %s3067_s18 = sld [smem:[#allocation29_spill]]  ;;  %s2858_s22 = sand.u32 1, %s2489_s30  }
  0x61   : > { %s706_s23 = scalar_lea.vmem %s3063_s29, %s1933_s0  ;;  %s2515_s29 = smov 112  }
  0x62   : > { %v2773_v3 = vld [vmem:[%s706_s23] sm:$0xff]  ;;  %v2249_v4 = vld [vmem:[%s3064_s25 + $0x8] sm:$0xff]   ;;  %2036 = vmatpush3.bf16.msra.mxu0 %v2248_v2  ;;  %2044 = vmatpush3.bf16.msra.mxu1 %v2252_v8  ;;  %s2516_s23 = smov 120   ;;  %s1726_s26 = scalar_lea.sflag [#allocation15], %s2858_s22 }
  0x63   : > { %v723_v5 = vpack.c.bf16 %v2773_v3, %v2773_v3  ;;  %2049 = vmatprep.subr.bf16.mxu0 %v2513_v0  ;;  %v2250_v6 = vld [vmem:[%s3064_s25] sm:$0xff]   ;;  %2057 = vmatprep.subr.bf16.mxu1 %v2513_v0  ;;  %s2522_s27 = smov [#allocation14]  }
  0x64   : > { %v1936_v9 = vld [vmem:[%s3065_s5] ss:$0 sm:$0xff]  ;;  %s2391_s6 = sshll.u32 %s2522_s27, 4  ;;  %s2392_s6 = int_to_ptr.vmem [resolvable:$false] %s2391_s6 }
  0x65   : > { %2038 = vmatmul.mubr.msk.bf16.vlgmr.msra.gmra.mxu0 %vm747_vm1, %v723_v5  ;;  %2046 = vmatmul.mubr.msk.bf16.vlgmr.msra.gmra.mxu1 %vm747_vm1, %v723_v5  ;;  %v1944_v16 = vld [vmem:[%s3066_s28] ss:$0 sm:$0xff]  ;;  %s2519_s28 = smov 8  }
  0x66   : > { %2050 = vmatpush3.bf16.msra.mxu0 %v2249_v4  ;;  %2053 = vmatprep.mubr.msk.bf16.mxu0 %vm2514_vm0, %v2513_v0  ;;  %s714_s2 = scalar_lea.vmem %s3067_s18, %s1933_s0  ;;  %s1932_s0 = sshll.u32 %s2858_s22, 4 }
  0x67   : > { %2051 = vmatprep.subr.bf16.mxu0 %v2513_v0  ;;  %2059 = vmatprep.mubr.msk.bf16.mxu1 %vm2514_vm0, %v2513_v0  ;;  %v979_v45 = vld [vmem:[%s714_s2] sm:$0x3]  ;;  %v1952_v55 = vld [vmem:[%s714_s2 + $0x2] sm:$0x3]  ;;  %v1958_v57 = vld [vmem:[%s714_s2 + $0x4] sm:$0x3] }
  0x68   : > { %vm980_vm5 = vnez %v979_v45  ;;  %vm1104_vm7 = vnez %v1952_v55  ;;  %vm1235_vm8 = vnez %v1958_v57  ;;  %v1963_v62 = vld [vmem:[%s714_s2 + $0x6] sm:$0x3]  ;;  %s2864_s24 = scalar_lea.vmem [#allocation14], %s1932_s0 }
  0x69   : > { %v981_v47 = vsel %vm980_vm5, 16843009, %v2518_v46  ;;  %v1105_v56 = vsel %vm1104_vm7, 16843009, %v2518_v46  ;;  %v1236_v59 = vsel %vm1235_vm8, 16843009, %v2518_v46  ;;  %vm1363_vm10 = vnez %v1963_v62 }
  0x6a   : > { %2052 = vmatpush3.bf16.msra.mxu0 %v2250_v6  ;;  %v982_v48 = vunpack.c.0.s8 %v981_v47  ;;  %v1106_v58 = vunpack.c.0.s8 %v1105_v56  ;;  %v1237_v2 = vunpack.c.0.s8 %v1236_v59  ;;  %v1364_v6 = vsel %vm1363_vm10, 16843009, %v2518_v46  ;;  %s1754_s0 = sshll.u32 %s2864_s24, 4  ;;  %s2935_s0 = int_to_ptr.vmem [resolvable:$true] %s1754_s0 }
  0x6b   : > { %2063 = vmatprep.subr.bf16.mxu0 %v2513_v0  ;;  %s2387_s1 = scalar_lea.vmem %s2935_s0, 256  ;;  %p2394_p6 = scmp.lt.s32.totalorder %s2935_s0, %s2392_s6 }
  0x6c   : > { %vm983_vm6 = vcmp.ne.s32.totalorder %v982_v48, 0  ;;  %vm1107_vm9 = vcmp.ne.s32.totalorder %v1106_v58, 0  ;;  %vm1238_vm11 = vcmp.ne.s32.totalorder %v1237_v2, 0  ;;  %p2388_p11 = scmp.ne.s32.totalorder %s2935_s0, %s2387_s1 }
  0x6d   : > { %2054 = vmatmul.mubr.msk.bf16.vlgmr.msra.gmra.mxu0 %vm747_vm1, %v723_v5 }
  0x6e   : > { %2065 = vmatprep.mubr.msk.bf16.mxu0 %vm2514_vm0, %v2513_v0  ;;  %p2389_p13 = pnand %p2388_p11, %p2666_p4 }
  0x70   : > { %p2390_p0 = pneg %p2389_p13 }
 0x125   : > { %v785_v10 = vpop.f32.mrf.mxu0  ;;  %v851_v28 = vpop.f32.mrf.mxu1 }
 0x126   : > { %v786_v11 = vadd.f32 %v1936_v9, %v785_v10  ;;  %v852_v29 = vadd.f32 %v1940_v27, %v851_v28 }
 0x127   : > { %v2039_v12 = vpop.f32.mrf.mxu0  ;;  %v2047_v30 = vpop.f32.mrf.mxu1 }
 0x128   : > { %v791_v13 = vpack.c.bf16 %v786_v11, %v786_v11  ;;  %v857_v31 = vpack.c.bf16 %v852_v29, %v852_v29  ;;  %v1365_v11 = vunpack.c.0.s8 %v1364_v6 }
 0x129   : > { %v788_v14 = vpop.f32.mrf.mxu0  ;;  %v854_v32 = vpop.f32.mrf.mxu1 }
 0x12a   : > { %793 = vst.msk [vmem:[#allocation2] sm:$0xf] %vm792_vm2, %v791_v13  ;;  %858 = vst.msk [vmem:[#allocation3] sm:$0xf] %vm792_vm2, %v857_v31  ;;  %vm1366_vm12 = vcmp.ne.s32.totalorder %v1365_v11, 0  ;;  %v2255_v11 = vld [vmem:[#allocation10 + $0x8] sm:$0xff]  }
 0x12b   : > { %v2040_v15 = vpop.f32.mrf.mxu0  ;;  %v2048_v33 = vpop.f32.mrf.mxu1  ;;  %vm1437_vm2 = vcmask 257216  }
 0x12d   : > { %v922_v17 = vpop.f32.mrf.mxu0 }
 0x12e   : > { %v923_v18 = vadd.f32 %v1944_v16, %v922_v17 }
 0x12f   : > { %v2055_v19 = vpop.f32.mrf.mxu0 }
 0x130   : > { %v928_v20 = vmul.f32 0.35355338, %v923_v18 }
 0x131   : > { %v925_v21 = vpop.f32.mrf.mxu0  ;;  %v930_v22 = vld [vmem:[#allocation2] sm:$0xf]  ;;  %v2820_v34 = vld [vmem:[#allocation3] sm:$0xf] }
 0x132   : > { %v937_v23 = vsel %vm932_vm3, %v930_v22, 0  ;;  %v1950_v24 = vcombine.low %v930_v22, %v930_v22  ;;  %v929_v26 = vpack.c.bf16 %v928_v20, %v928_v20  ;;  %v1004_v35 = vsel %vm1002_vm4, %v2820_v34, 0 }
 0x133   : > { %2058 = vmatpush3.bf16.xpose.msra.mxu1 %v937_v23  ;;  %v2056_v25 = vpop.f32.mrf.mxu0  ;;  %2064 = vmatpush3.bf16.msra.mxu0 %v1004_v35 }
 0x134   : > { %1185 = vrot.lane.b32.xlu1 %v1950_v24, %s2515_s29  ;;  %1054 = vrot.lane.b32.xlu0 %v1950_v24, %s2516_s23  ;;  %v1954_v25 = vcombine.low %v2820_v34, %v2820_v34 }
 0x135   : > { %2069 = vmatprep.subr.bf16.mxu1 %v2513_v0  ;;  %2075 = vmatprep.subr.bf16.mxu0 %v2513_v0 }
 0x138   : > { %1183 = vrot.lane.b32.xlu1 %v929_v26, %s2515_s29  ;;  %1049 = vrot.lane.b32.xlu0 %v929_v26, %s2516_s23 }
 0x13a   : > { %2060 = vmatmul.mubr.msk.bf16.vlgmr.msra.gmra.mxu1 %vm932_vm3, %v929_v26 }
 0x13b   : > { %2071 = vmatprep.mubr.msk.bf16.mxu1 %vm2514_vm0, %v2513_v0 }
 0x13c   : > { %1311 = vrot.lane.b32.xlu1 %v929_v26, %s2517_s20  ;;  %1313 = vrot.lane.b32.xlu0 %v1950_v24, %s2517_s20 }
 0x1a6   : > { %v1055_v36 = vpop.permute.xlu0 %1054  ;;  %v1186_v38 = vpop.permute.xlu1 %1185 }
 0x1a7   : > { %v1060_v37 = vsel %vm932_vm3, %v1055_v36, 0  ;;  %v1191_v40 = vsel %vm932_vm3, %v1186_v38, 0 }
 0x1a8   : > { %2070 = vmatpush3.bf16.xpose.msra.mxu1 %v1060_v37 }
 0x1a9   : > { %2081 = vmatprep.subr.bf16.mxu1 %v2513_v0 }
 0x1aa   : > { %v1050_v39 = vpop.permute.xlu0 %1049  ;;  %v1184_v42 = vpop.permute.xlu1 %1183 }
 0x1ae   : > { %v1314_v41 = vpop.permute.xlu0 %1313  ;;  %v1312_v44 = vpop.permute.xlu1 %1311 }
 0x1af   : > { %2072 = vmatmul.mubr.msk.bf16.vlgmr.msra.gmra.mxu1 %vm932_vm3, %v1050_v39  ;;  %v1319_v43 = vsel %vm932_vm3, %v1314_v41, 0 }
 0x1b0   : > { %2082 = vmatpush3.bf16.xpose.msra.mxu1 %v1191_v40  ;;  %2083 = vmatprep.mubr.msk.bf16.mxu1 %vm2514_vm0, %v2513_v0 }
 0x1b1   : > { %2093 = vmatprep.subr.bf16.mxu1 %v2513_v0 }
 0x1b7   : > { %2084 = vmatmul.mubr.msk.bf16.vlgmr.msra.gmra.mxu1 %vm932_vm3, %v1184_v42 }
 0x1b8   : > { %2094 = vmatpush3.bf16.xpose.msra.mxu1 %v1319_v43  ;;  %2095 = vmatprep.mubr.msk.bf16.mxu1 %vm2514_vm0, %v2513_v0 }
 0x1b9   : > { %2105 = vmatprep.subr.bf16.mxu1 %v2513_v0 }
 0x1bf   : > { %2096 = vmatmul.mubr.msk.bf16.vlgmr.msra.gmra.mxu1 %vm932_vm3, %v1312_v44 }
 0x1c0   : > { %2109 = vmatprep.mubr.msk.bf16.mxu1 %vm2514_vm0, %v2513_v0  ;;  %2106 = vmatpush3.bf16.msra.mxu1 %v2255_v11 }
 0x1c1   : > { %2107 = vmatprep.subr.bf16.mxu1 %v2513_v0 }
 0x1fa   : > { %v973_v49 = vpop.f32.mrf.mxu1 }
 0x1fb   : > { %v984_v50 = vsel %vm983_vm6, 1e-10, %v973_v49 }
 0x1fc   : > { %v2061_v51 = vpop.f32.mrf.mxu1  ;;  %v985_v52 = vsel %vm932_vm3, %v984_v50, -inf }
 0x1fd   : > { %986 = vmax.xlane.f32.xlu0 %v985_v52 }
 0x1fe   : > { %v976_v53 = vpop.f32.mrf.mxu1 }
 0x200   : > { %v2062_v54 = vpop.f32.mrf.mxu1 }
 0x26f   : > { %v1096_v60 = vpop.f32.mrf.mxu1 }
 0x270   : > { %v1108_v61 = vsel %vm1107_vm9, 1e-10, %v1096_v60 }
 0x271   : > { %v2073_v63 = vpop.f32.mrf.mxu1  ;;  %v1109_v1 = vsel %vm932_vm3, %v1108_v61, -inf }
 0x272   : > { %1110 = vmax.xlane.f32.xlu1 %v1109_v1 }
 0x273   : > { %v1099_v4 = vpop.f32.mrf.mxu1 }
 0x275   : > { %v2074_v5 = vpop.f32.mrf.mxu1 }
 0x277   : > { %v1227_v7 = vpop.f32.mrf.mxu1 }
 0x278   : > { %v1239_v8 = vsel %vm1238_vm11, 1e-10, %v1227_v7 }
 0x279   : > { %v2085_v9 = vpop.f32.mrf.mxu1  ;;  %v1240_v10 = vsel %vm932_vm3, %v1239_v8, -inf }
 0x27a   : > { %1241 = vmax.xlane.f32.xlu0 %v1240_v10 }
 0x27b   : > { %v1230_v12 = vpop.f32.mrf.mxu1 }
 0x27d   : > { %v2086_v13 = vpop.f32.mrf.mxu1 }
 0x27e   : > { %v2256_v13 = vld [vmem:[#allocation10] sm:$0xff]  }
 0x27f   : > { %v1355_v14 = vpop.f32.mrf.mxu1  ;;  %2108 = vmatpush3.bf16.msra.mxu1 %v2256_v13 }
 0x280   : > { %v1367_v15 = vsel %vm1366_vm12, 1e-10, %v1355_v14  ;;  %2121 = vmatprep.subr.bf16.mxu1 %v2513_v0 }
 0x281   : > { %v2097_v16 = vpop.f32.mrf.mxu1  ;;  %v1368_v17 = vsel %vm932_vm3, %v1367_v15, -inf }
 0x282   : > { %1369 = vmax.xlane.f32.xlu0 %v1368_v17 }
 0x283   : > { %v1358_v18 = vpop.f32.mrf.mxu1 }
 0x285   : > { %v2098_v19 = vpop.f32.mrf.mxu1 }
 0x286   : > { %v987_v20 = vpop.xlane.xlu0 %986 }
 0x287   : > { %v988_v21 = vsub.f32 %v984_v50, %v987_v20 }
 0x289   : > { %v989_v22 = vmul.f32 1.442695, %v988_v21 }
 0x28b   : > { %2263 = vpow2.f32 %v989_v22 }
 0x298   : > { %v2264_v23 = vpop.eup %2263 }
 0x299   : > { %v991_v24 = vsel %vm932_vm3, %v2264_v23, 0.0 }
 0x29a   : > { %992 = vadd.xlane.f32.xlu1 %v991_v24 }
 0x2ab   : > { %1126 = vrot.lane.b32.xlu1 %v1954_v25, %s2516_s23  ;;  %s2521_s23 = smov 24  }
 0x2fb   : > { %v1111_v26 = vpop.xlane.xlu1 %1110 }
 0x2fc   : > { %v1112_v27 = vsub.f32 %v1108_v61, %v1111_v26 }
 0x2fe   : > { %v1113_v28 = vmul.f32 1.442695, %v1112_v27  ;;  %v1967_v27 = vld [vmem:[%s3021_s9] ss:$0 sm:$0xff] }
 0x300   : > { %2265 = vpow2.f32 %v1113_v28 }
 0x303   : > { %v1242_v29 = vpop.xlane.xlu0 %1241 }
 0x304   : > { %v1243_v30 = vsub.f32 %v1239_v8, %v1242_v29 }
 0x306   : > { %v1244_v31 = vmul.f32 1.442695, %v1243_v30 }
 0x308   : > { %2267 = vpow2.f32 %v1244_v31 }
 0x30b   : > { %v1370_v32 = vpop.xlane.xlu0 %1369 }
 0x30c   : > { %v1371_v33 = vsub.f32 %v1367_v15, %v1370_v32 }
 0x30d   : > { %v2266_v35 = vpop.eup %2265 }
 0x30e   : > { %v1372_v36 = vmul.f32 1.442695, %v1371_v33  ;;  %v1115_v37 = vsel %vm932_vm3, %v2266_v35, 0.0 }
 0x30f   : > { %1116 = vadd.xlane.f32.xlu0 %v1115_v37 }
 0x310   : > { %2269 = vpow2.f32 %v1372_v36 }
 0x315   : > { %v2268_v34 = vpop.eup %2267 }
 0x316   : > { %v1246_v38 = vsel %vm932_vm3, %v2268_v34, 0.0 }
 0x317   : > { %1247 = vadd.xlane.f32.xlu1 %v1246_v38 }
 0x31d   : > { %v2270_v39 = vpop.eup %2269 }
 0x31e   : > { %v1374_v40 = vsel %vm932_vm3, %v2270_v39, 0.0 }
 0x31f   : > { %1375 = vadd.xlane.f32.xlu0 %v1374_v40  ;;  %v2257_v40 = vld [vmem:[#allocation11 + $0x8] sm:$0xff]  }
 0x323   : > { %v993_v41 = vpop.xlane.xlu1 %992 }
 0x324   : > { %2271 = vrcp.f32 %v993_v41  ;;  %v2258_v41 = vld [vmem:[#allocation11] sm:$0xff]  }
 0x327   : > { %v1127_v44 = vpop.permute.xlu1 %1126 }
 0x328   : > { %1382 = vrot.lane.b32.xlu1 %v1954_v25, %s2517_s20  ;;  %v1132_v46 = vsel %vm1002_vm4, %v1127_v44, 0 }
 0x331   : > { %v2272_v42 = vpop.eup %2271 }
 0x332   : > { %v995_v43 = vmul.f32 %v2272_v42, %v2264_v23  ;;  %v2260_v42 = vld [vmem:[%s3026_s14 + $0x10] sm:$0xff]  }
 0x334   : > { %v996_v45 = vpack.c.bf16 %v995_v43, %v995_v43 }
 0x335   : > { %1254 = vrot.lane.b32.xlu0 %v1954_v25, %s2515_s29  ;;  %s2520_s29 = smov 16  }
 0x336   : > { %2066 = vmatmul.mubr.msk.bf16.vlgmr.msra.gmra.mxu0 %vm932_vm3, %v996_v45  ;;  %998 = vst.msk [vmem:[%s2864_s24] sm:$0xf] %vm997_vm13, %v996_v45 }
 0x337   : > { %2076 = vmatpush3.bf16.msra.mxu0 %v1132_v46  ;;  %2077 = vmatprep.mubr.msk.bf16.mxu0 %vm2514_vm0, %v2513_v0 }
 0x338   : > { %2087 = vmatprep.subr.bf16.mxu0 %v2513_v0 }
 0x398   : > { %v1117_v47 = vpop.xlane.xlu0 %1116 }
 0x399   : > { %2273 = vrcp.f32 %v1117_v47  ;;  %v1971_v47 = vld [vmem:[%s3022_s10] ss:$0 sm:$0xff] }
 0x3a0   : > { %v1248_v48 = vpop.xlane.xlu1 %1247 }
 0x3a1   : > { %2275 = vrcp.f32 %v1248_v48 }
 0x3a4   : > { %v1383_v57 = vpop.permute.xlu1 %1382 }
 0x3a5   : > { %v1388_v59 = vsel %vm1002_vm4, %v1383_v57, 0 }
 0x3a6   : > { %v2274_v49 = vpop.eup %2273 }
 0x3a7   : > { %v1119_v50 = vmul.f32 %v2274_v49, %v2266_v35  ;;  %v1972_v49 = vld [vmem:[%s3023_s11] ss:$0 sm:$0xff] }
 0x3a8   : > { %v1376_v51 = vpop.xlane.xlu0 %1375 }
 0x3a9   : > { %2277 = vrcp.f32 %v1376_v51  ;;  %v1120_v52 = vpack.c.bf16 %v1119_v50, %v1119_v50 }
 0x3ab   : > { %2078 = vmatmul.mubr.msk.bf16.vlgmr.msra.gmra.mxu0 %vm932_vm3, %v1120_v52  ;;  %1953 = vst.msk [vmem:[%s2864_s24 + $0x4] sm:$0xf] %vm997_vm13, %v1120_v52 }
 0x3ac   : > { %v1255_v53 = vpop.permute.xlu0 %1254  ;;  %2089 = vmatprep.mubr.msk.bf16.mxu0 %vm2514_vm0, %v2513_v0 }
 0x3ad   : > { %v1260_v54 = vsel %vm1002_vm4, %v1255_v53, 0  ;;  %v2261_v53 = vld [vmem:[%s3026_s14 + $0x8] sm:$0xff]  }
 0x3ae   : > { %v2276_v55 = vpop.eup %2275  ;;  %2088 = vmatpush3.bf16.msra.mxu0 %v1260_v54  ;;  %v2262_v54 = vld [vmem:[%s3026_s14] sm:$0xff]  }
 0x3af   : > { %2099 = vmatprep.subr.bf16.mxu0 %v2513_v0  ;;  %v1250_v56 = vmul.f32 %v2276_v55, %v2268_v34  ;;  %v1973_v55 = vld [vmem:[%s3025_s13] ss:$0 sm:$0xff] }
 0x3b1   : > { %v1251_v58 = vpack.c.bf16 %v1250_v56, %v1250_v56 }
 0x3b3   : > { %2090 = vmatmul.mubr.msk.bf16.vlgmr.msra.gmra.mxu0 %vm932_vm3, %v1251_v58  ;;  %1959 = vst.msk [vmem:[%s2864_s24 + $0x8] sm:$0xf] %vm997_vm13, %v1251_v58 }
 0x3b4   : > { %2100 = vmatpush3.bf16.msra.mxu0 %v1388_v59  ;;  %2101 = vmatprep.mubr.msk.bf16.mxu0 %vm2514_vm0, %v2513_v0 }
 0x3b5   : > { %2113 = vmatprep.subr.bf16.mxu0 %v2513_v0 }
 0x3b6   : > { %v2278_v60 = vpop.eup %2277 }
 0x3b7   : > { %v1378_v61 = vmul.f32 %v2278_v60, %v2270_v39 }
 0x3b9   : > { %v1379_v62 = vpack.c.bf16 %v1378_v61, %v1378_v61 }
 0x3bb   : > { %2102 = vmatmul.mubr.msk.bf16.vlgmr.msra.gmra.mxu0 %vm932_vm3, %v1379_v62  ;;  %1964 = vst.msk [vmem:[%s2864_s24 + $0xc] sm:$0xf] %vm997_vm13, %v1379_v62  ;;  %s2393_s24 = scalar_lea.vmem %s2392_s6, 512 }
 0x3bc   : > { %2117 = vmatprep.mubr.msk.bf16.mxu0 %vm2514_vm0, %v2513_v0  ;;  %2114 = vmatpush3.bf16.msra.mxu0 %v2257_v40  ;;  %p2395_p7 = scmp.lt.s32.totalorder %s2393_s24, %s2387_s1 }
 0x3bd   : > { %2115 = vmatprep.subr.bf16.mxu0 %v2513_v0 }
 0x3be   : > { %p2396_p9 = por %p2395_p7, %p2394_p6 }
 0x3c0   : > { %2116 = vmatpush3.bf16.msra.mxu0 %v2258_v41  ;;  %p2397_p12 = pnand %p2396_p9, %p2390_p0 }
 0x3f6   : > { %v1040_v63 = vpop.f32.mrf.mxu0 }
 0x3f7   : > { %v1046_v1 = vpack.c.bf16 %v1040_v63, %v1040_v63 }
 0x3f8   : > { %v2067_v2 = vpop.f32.mrf.mxu0 }
 0x3f9   : > { %1047 = vst.msk [vmem:[#allocation4] sm:$0xf] %vm997_vm13, %v1046_v1 }
 0x3fa   : > { %v1043_v4 = vpop.f32.mrf.mxu0 }
 0x3fc   : > { %v2068_v5 = vpop.f32.mrf.mxu0 }
 0x46b   : > { %v1168_v6 = vpop.f32.mrf.mxu0 }
 0x46c   : > { %v1993_v7 = vpack.c.bf16 %v1168_v6, %v1168_v6 }
 0x46d   : > { %v2079_v8 = vpop.f32.mrf.mxu0 }
 0x46e   : > { %1178 = vrot.lane.b32.xlu1 %v1993_v7, %s2519_s28  ;;  %s1996_s28 = sshll.u32 %s2497_s21, 8 }
 0x46f   : > { %v1171_v9 = vpop.f32.mrf.mxu0  ;;  %s2940_s20 = scalar_lea.hbm %s3031_s19, %s1996_s28 }
 0x471   : > { %v2080_v10 = vpop.f32.mrf.mxu0 }
 0x473   : > { %v1296_v12 = vpop.f32.mrf.mxu0 }
 0x474   : > { %v1994_v14 = vpack.c.bf16 %v1296_v12, %v1296_v12 }
 0x475   : > { %v2091_v15 = vpop.f32.mrf.mxu0 }
 0x476   : > { %1306 = vrot.lane.b32.xlu0 %v1994_v14, %s2520_s29 }
 0x477   : > { %v1299_v16 = vpop.f32.mrf.mxu0 }
 0x479   : > { %v2092_v17 = vpop.f32.mrf.mxu0 }
 0x47b   : > { %v1424_v18 = vpop.f32.mrf.mxu0 }
 0x47c   : > { %v1995_v19 = vpack.c.bf16 %v1424_v18, %v1424_v18 }
 0x47d   : > { %v2103_v20 = vpop.f32.mrf.mxu0 }
 0x47e   : > { %1434 = vrot.lane.b32.xlu1 %v1995_v19, %s2521_s23 }
 0x47f   : > { %v1427_v21 = vpop.f32.mrf.mxu0 }
 0x481   : > { %v2104_v22 = vpop.f32.mrf.mxu0 }
 0x4e0   : > { %v1179_v23 = vpop.permute.xlu1 %1178 }
 0x4e1   : > { %1182 = vst.msk [vmem:[#allocation4] sm:$0xf] %vm1181_vm14, %v1179_v23 }
 0x4e8   : > { %v1307_v24 = vpop.permute.xlu0 %1306 }
 0x4e9   : > { %1310 = vst.msk [vmem:[#allocation4] sm:$0xf] %vm1309_vm15, %v1307_v24 }
 0x4f0   : > { %v1435_v25 = vpop.permute.xlu1 %1434 }
 0x4f1   : > { %1438 = vst.msk [vmem:[#allocation4] sm:$0xf] %vm1437_vm2, %v1435_v25 }
 0x4f8   : > { %v1439_v26 = vld [vmem:[#allocation4] sm:$0xf] }
 0x4f9   : > { %2110 = vmatmul.mubr.msk.bf16.vlgmr.msra.gmra.mxu1 %vm747_vm1, %v1439_v26 }
 0x4fa   : > { %2129 = vmatprep.mubr.msk.bf16.mxu1 %vm2514_vm0, %v2513_v0  ;;  %vm1645_vm0 = vcmask 523264  }
 0x5b9   : > { %v1500_v28 = vpop.f32.mrf.mxu1 }
 0x5ba   : > { %v1501_v29 = vadd.f32 %v1967_v27, %v1500_v28 }
 0x5bb   : > { %v2111_v30 = vpop.f32.mrf.mxu1 }
 0x5bc   : > { %v1506_v31 = vadd.f32 %v1501_v29, %v2773_v3  ;;  %v2259_v3 = vld [vmem:[%s3026_s14 + $0x18] sm:$0xff]  }
 0x5bd   : > { %v1503_v32 = vpop.f32.mrf.mxu1  ;;  %2122 = vmatpush3.bf16.msra.mxu1 %v2259_v3 }
 0x5be   : > { %v1507_v33 = vsel %vm747_vm1, %v1506_v31, 0.0  ;;  %2123 = vmatprep.subr.bf16.mxu1 %v2513_v0 }
 0x5bf   : > { %1508 = vadd.xlane.f32.xlu0 %v1507_v33  ;;  %v2112_v35 = vpop.f32.mrf.mxu1 }
 0x5c1   : > { %2124 = vmatpush3.bf16.msra.mxu1 %v2260_v42 }
 0x5c2   : > { %2125 = vmatprep.subr.bf16.mxu1 %v2513_v0 }
 0x5c5   : > { %2126 = vmatpush3.bf16.msra.mxu1 %v2261_v53 }
 0x5c6   : > { %2127 = vmatprep.subr.bf16.mxu1 %v2513_v0  ;;  %v1977_v0 = vld [vmem:[%s3027_s15] ss:$0 sm:$0xff] }
 0x5c9   : > { %2128 = vmatpush3.bf16.msra.mxu1 %v2262_v54 }
 0x648   : > { %v1509_v36 = vpop.xlane.xlu0 %1508 }
 0x649   : > { %v1511_v37 = vmul.f32 0.03125, %v1509_v36 }
 0x64b   : > { %v1512_v34 = vsub.f32 %v1506_v31, %v1511_v37 }
 0x64d   : > { %v1513_v38 = vmul.f32 %v1512_v34, %v1512_v34 }
 0x64f   : > { %v1514_v39 = vsel %vm747_vm1, %v1513_v38, 0.0 }
 0x650   : > { %1515 = vadd.xlane.f32.xlu1 %v1514_v39 }
 0x6d9   : > { %v1516_v43 = vpop.xlane.xlu1 %1515 }
 0x6da   : > { %v1517_v44 = vmul.f32 0.03125, %v1516_v43 }
 0x6dc   : > { %v1518_v45 = vadd.f32 1e-05, %v1517_v44 }
 0x6de   : > { %2279 = vrsqrt.f32 %v1518_v45 }
 0x6eb   : > { %v2280_v46 = vpop.eup %2279 }
 0x6ec   : > { %v1520_v48 = vmul.f32 %v2280_v46, %v1512_v34 }
 0x6ee   : > { %v1528_v50 = vmul.f32 %v1971_v47, %v1520_v48 }
 0x6f0   : > { %v1536_v51 = vadd.f32 %v1972_v49, %v1528_v50 }
 0x6f2   : > { %v1537_v52 = vpack.c.bf16 %v1536_v51, %v1536_v51 }
 0x6f4   : > { %2118 = vmatmul.mubr.msk.bf16.vlgmr.msra.gmra.mxu0 %vm747_vm1, %v1537_v52 }
 0x7b4   : > { %v1598_v56 = vpop.f32.mrf.mxu0 }
 0x7b5   : > { %v1599_v57 = vadd.f32 %v1973_v55, %v1598_v56 }
 0x7b6   : > { %v2119_v58 = vpop.f32.mrf.mxu0 }
 0x7b7   : > { %v1604_v59 = vmax.f32 %v1599_v57, 0.0 }
 0x7b8   : > { %v1601_v60 = vpop.f32.mrf.mxu0 }
 0x7b9   : > { %v1605_v61 = vpack.c.bf16 %v1604_v59, %v1604_v59 }
 0x7ba   : > { %v2120_v62 = vpop.f32.mrf.mxu0 }
 0x7bb   : > { %2130 = vmatmul.mubr.msk.bf16.vlgmr.msra.gmra.mxu1 %vm1645_vm0, %v1605_v61 }
 0x87b   : > { %v1683_v63 = vpop.f32.mrf.mxu1 }
 0x87c   : > { %v1684_v1 = vadd.f32 %v1977_v0, %v1683_v63 }
 0x87d   : > { %v2131_v2 = vpop.f32.mrf.mxu1 }
 0x87e   : > { %v1689_v4 = vadd.f32 %v1684_v1, %v1536_v51 }
 0x87f   : > { %v1686_v5 = vpop.f32.mrf.mxu1 }
 0x880   : > { %v1690_v6 = vsel %vm747_vm1, %v1689_v4, 0.0 }
 0x881   : > { %1691 = vadd.xlane.f32.xlu0 %v1690_v6  ;;  %v2132_v7 = vpop.f32.mrf.mxu1 }
 0x90a   : > { %v1692_v8 = vpop.xlane.xlu0 %1691 }
 0x90b   : > { %v1693_v9 = vmul.f32 0.03125, %v1692_v8 }
 0x90d   : > { %v1694_v10 = vsub.f32 %v1689_v4, %v1693_v9 }
 0x90f   : > { %v1695_v11 = vmul.f32 %v1694_v10, %v1694_v10 }
 0x911   : > { %v1696_v12 = vsel %vm747_vm1, %v1695_v11, 0.0 }
 0x912   : > { %1697 = vadd.xlane.f32.xlu0 %v1696_v12 }
 0x913   : > { %2400 = shalt.err (!%p2397_p12)
}
 0x914   : > { %s2401_s18 = scalar_lea.hbm %s2940_s20, 256  ;;  %s2405_s29 = scalar_lea.hbm %s3031_s19, 512 }
 0x915   : > { %p2402_p2 = scmp.ne.s32.totalorder %s2940_s20, %s2401_s18  ;;  %p2406_p5 = scmp.lt.s32.totalorder %s2940_s20, %s3031_s19 }
 0x916   : > { %p2407_p10 = scmp.lt.s32.totalorder %s2405_s29, %s2401_s18 }
 0x917   : > { %p2403_p1 = pnand %p2402_p2, %p2666_p4 }
 0x918   : > { %p2408_p11 = por %p2407_p10, %p2406_p5 }
 0x919   : > { %p2404_p3 = pneg %p2403_p1 }
 0x91b   : > { %p2409_p13 = pnand %p2408_p11, %p2404_p3 }
 0x91d   : > { %2412 = shalt.err (!%p2409_p13)
}
 0x91e   : > { %s2523_s1 = smov 64   ;;  %s2524_s6 = smov 4   ;;  %v1983_v17 = vld [vmem:[%s3028_s16] ss:$0 sm:$0xff] }
 0x91f   : > { %2150 = dma.vmem_to_hbm [thread:$0]  (%p2666_p4), %s2935_s0, 256, %s2940_s20, %s1726_s26, %s2523_s1, %s2523_s1, %s2524_s6  }
 0x920   : > { %s1931_s24 = sshll.u32 %s2858_s22, 3  ;;  %v1984_v19 = vld [vmem:[%s3029_s17] ss:$0 sm:$0xff]  ;;  %s1987_s23 = sshll.u32 %s2497_s21, 7 }
 0x921   : > { %s695_s27 = scalar_lea.vmem [#allocation13], %s1931_s24  ;;  %s3068_s1 = sld [smem:[#allocation35_spill]] }
 0x922   : > { %s1740_s0 = sshll.u32 %s695_s27, 4  ;;  %s1721_s5 = scalar_lea.sflag [#allocation7], %s2858_s22  ;;  %s1741_s0 = int_to_ptr.vmem [resolvable:$true] %s1740_s0 }
 0x923   : > { %s2413_s18 = scalar_lea.vmem %s1741_s0, 128  ;;  %s2525_s2 = smov [#allocation13]  }
 0x924   : > { %p2414_p0 = scmp.ne.s32.totalorder %s1741_s0, %s2413_s18  ;;  %s2417_s28 = sshll.u32 %s2525_s2, 4  ;;  %s2418_s28 = int_to_ptr.vmem [resolvable:$false] %s2417_s28 }
 0x925   : > { %s2419_s21 = scalar_lea.vmem %s2418_s28, 256  ;;  %p2420_p9 = scmp.lt.s32.totalorder %s1741_s0, %s2418_s28 }
 0x926   : > { %p2415_p6 = pnand %p2414_p0, %p2666_p4  ;;  %p2421_p12 = scmp.lt.s32.totalorder %s2419_s21, %s2413_s18 }
 0x927   : > { %s3069_s6 = smov %s3068_s1  ;;  %s1738_s4 = scalar_lea.hbm %s3068_s1, %s1987_s23 }
 0x928   : > { %p2416_p7 = pneg %p2415_p6  ;;  %p2422_p2 = por %p2421_p12, %p2420_p9 }
 0x92a   : > { %p2423_p1 = pnand %p2422_p2, %p2416_p7 }
 0x99b   : > { %v1698_v13 = vpop.xlane.xlu0 %1697 }
 0x99c   : > { %v1699_v14 = vmul.f32 0.03125, %v1698_v13 }
 0x99e   : > { %v1700_v15 = vadd.f32 1e-05, %v1699_v14 }
 0x9a0   : > { %2281 = vrsqrt.f32 %v1700_v15 }
 0x9ad   : > { %v2282_v16 = vpop.eup %2281 }
 0x9ae   : > { %v1702_v18 = vmul.f32 %v2282_v16, %v1694_v10 }
 0x9b0   : > { %v1710_v20 = vmul.f32 %v1983_v17, %v1702_v18 }
 0x9b2   : > { %v1718_v21 = vadd.f32 %v1984_v19, %v1710_v20 }
 0x9b4   : > { %1719 = vst.msk [vmem:[%s695_s27] sm:$0xff] %vm747_vm1, %v1718_v21 }
 0x9b5   : > { %2426 = shalt.err (!%p2423_p1)
}
 0x9b6   : > { %s2427_s24 = scalar_lea.hbm %s1738_s4, 128  ;;  %s2431_s23 = scalar_lea.hbm %s3069_s6, 256 }
 0x9b7   : > { %p2428_p3 = scmp.ne.s32.totalorder %s1738_s4, %s2427_s24  ;;  %p2432_p11 = scmp.lt.s32.totalorder %s1738_s4, %s3069_s6 }
 0x9b8   : > { %p2433_p13 = scmp.lt.s32.totalorder %s2431_s23, %s2427_s24 }
 0x9b9   : > { %p2429_p5 = pnand %p2428_p3, %p2666_p4 }
 0x9ba   : > { %p2434_p0 = por %p2433_p13, %p2432_p11 }
 0x9bb   : > { %p2430_p10 = pneg %p2429_p5 }
 0x9bd   : > { %p2435_p6 = pnand %p2434_p0, %p2430_p10 }
 0x9bf   : > { %2438 = shalt.err (!%p2435_p6)
}
 0x9c0   : > { %2149 = dma.vmem_to_hbm [thread:$0]  (%p2666_p4), %s1741_s0, 128, %s1738_s4, %s1721_s5  }
 0x9c1 PF: > { %s3070_s26 = sld [smem:[#allocation24_spill]] }
 0x9c2   : > { %s3071_s1 = sld [smem:[#allocation21_spill]] }
 0x9c7   : > { %p2181_p7 = scmp.ge.s32.totalorder %s3070_s26, 2 }
 0x9c8   : > { %s1769_s2 = sand.u32 1, %s3071_s1  }
 0x9c9   : > { %p2167_p9 = pnand %p2181_p7, %p2673_p8  ;;  %s1770_s28 = scalar_lea.sflag [#allocation7], %s1769_s2 }
 0x9cb   : > { %p2168_p12 = pneg %p2167_p9 }
 0x9cd   : > { %2476 = dma.done.wait (%p2168_p12), %s1770_s28, 128  }
 0x9ce   : > { %2478 = vsyncadd (%p2168_p12), %s1770_s28, 4294967168  ;;  %s1779_s21 = scalar_lea.sflag [#allocation15], %s1769_s2 }
 0x9cf   : > { %2480 = dma.done.wait (%p2168_p12), %s1779_s21, 256  }
 0x9d0   : > { %2482 = vsyncadd (%p2168_p12), %s1779_s21, 4294967040  ;;  %s39_s22 = sadd.s32 1, %s3070_s26   ;;  %s3073_s4 = sld [smem:[#allocation22_spill]] }
 0x9d1   : > { %p36_p2 = scmp.ge.s32.totalorder %s39_s22, 4   ;;  %s3074_s20 = sld [smem:[#allocation27_spill]] }
 0x9d2   : > { %s3075_s21 = sld [smem:[#allocation23_spill]]  ;;  %s3077_s0 = smov %s2489_s30 }
 0x9d3   : > { %s3076_s1 = sld [smem:[#allocation25_spill]]  ;;  %38 = sbr.rel (!%p36_p2) target bundleno = 18 (0x12), region = 174 }
 0x9d6   : > { %s3078_s30 = smov %s3073_s4 }
 0x9d8   :  { %1784 = vsyncpa [#allocation6], 1 }
 0x9d9   :  { %1786 = vsyncpa [#allocation6 + $0x1], 1 }
 0x9da   :  { %1787 = vsyncpa [#allocation9], 1 }
 0x9db   :  { %1788 = vsyncpa [#allocation12], 1 }
 0x9dc   :  { %1789 = vsyncpa [#allocation7], 1 }
 0x9dd   :  { %1791 = vsyncpa [#allocation7 + $0x1], 1 }
 0x9de   :  { %1792 = vsyncpa [#allocation15], 1 }
 0x9df   :  { %1794 = vsyncpa [#allocation15 + $0x1], 1 }

</bundles_post_ra>
